<compile_context>
chip_gen: v7x
topology: tpu7x:2x2x1
jax: 0.10.0
libtpu: 0.0.40
codegen_flags: <defaults>
</compile_context>

<pallas_src>
import functools

import numpy as np
import jax
import jax.numpy as jnp
from jax.experimental import pallas as pl
from jax.experimental.pallas import tpu as pltpu


def _pick_tile_rows(H, W, target_rows=512):
    """Largest divisor of H whose tile has roughly `target_rows` output rows."""
    tr = max(1, min(H, target_rows // max(W, 1)))
    while H % tr:
        tr -= 1
    return tr


def _bottleneck_kernel(x_ref, w1_ref, b1_ref, w2_ref, b2_ref, w3_ref, b3_ref,
                       lm_ref, rm_ref, o_ref, h1pad_ref, *opt_scratch,
                       H, W, Cin, width, tile_rows, pad,
                       compute_dtype, use_im2col):
    rt = pl.program_id(1)
    n_tiles = pl.num_programs(1)
    M = tile_rows * W              # output rows produced this grid step
    Mh = (tile_rows + 2) * W       # h1 rows incl. one halo image-row per side
    row0 = rt * tile_rows          # first image row of this tile

    w1 = w1_ref[...]               # (Cin, width), BN scale pre-folded
    b1 = b1_ref[...]               # (1, width), float32

    def conv1(row_start, nrows):
        """conv1x1 + BN bias + ReLU on `nrows` image rows starting at row_start."""
        xs = x_ref[0, pl.ds(row_start, nrows)]               # (nrows, W, Cin)
        xs = xs.reshape(nrows * W, Cin).astype(compute_dtype)
        h = jnp.dot(xs, w1, preferred_element_type=jnp.float32)
        return jnp.maximum(h + b1, 0.0).astype(compute_dtype)

    # ---- h1 buffer layout: [guard | top halo row | tile rows | bottom halo | guard]
    zero_guard = jnp.zeros((pad, width), compute_dtype)
    zero_row = jnp.zeros((W, width), compute_dtype)
    # Guard rows: only one element of each is ever read and only at positions
    # killed by the left/right masks; zero them anyway so stale VMEM can never
    # leak through.  Re-zeroed every step => safe under "parallel" partitioning.
    h1pad_ref[0:pad, :] = zero_guard
    h1pad_ref[pad + Mh:, :] = zero_guard

    # Tile rows.
    h1pad_ref[pad + W:pad + W + M, :] = conv1(row0, tile_rows)

    # Halo rows are recomputed from the neighbouring image rows (clamped at the
    # image edge) and zeroed at the image boundary -> conv3x3 zero-padding.
    h1pad_ref[pad:pad + W, :] = conv1(jnp.maximum(row0 - 1, 0), 1)

    @pl.when(rt == 0)
    def _():
        h1pad_ref[pad:pad + W, :] = zero_row

    h1pad_ref[pad + W + M:pad + Mh, :] = conv1(
        jnp.minimum(row0 + tile_rows, H - 1), 1)

    @pl.when(rt == n_tiles - 1)
    def _():
        h1pad_ref[pad + W + M:pad + Mh, :] = zero_row

    # ---- conv3x3 (stride 1, pad 1) on flattened rows ------------------------
    lm = lm_ref[...]               # (M, 1): 0 where col == 0     (no left nbr)
    rm = rm_ref[...]               # (M, 1): 0 where col == W - 1 (no right nbr)

    def window(ky, kx):
        # kx=+-1 windows start one sublane row off the 8-aligned offset; a
        # pltpu.roll of the aligned window would move that realign to the XLU.
        start = pad + ky * W + kx - 1
        win = h1pad_ref[start:start + M, :]
        if kx == 0:
            win = win * lm
        elif kx == 2:
            win = win * rm
        return win

    if use_im2col:
        # Narrow stages: one long-K im2col matmul keeps the MXU K dim filled.
        patch_ref = opt_scratch[0]
        for ky in range(3):
            for kx in range(3):
                k = ky * 3 + kx
                patch_ref[:, k * width:(k + 1) * width] = window(ky, kx)
        h2 = jnp.dot(patch_ref[...], w2_ref[...],
                     preferred_element_type=jnp.float32)
    else:
        # Wide stages (width >= 128): each tap already fills the MXU K dim, so
        # skip the 9x activation duplicate and accumulate 9 matmuls in f32.
        h2 = jnp.zeros((M, width), jnp.float32)
        for ky in range(3):
            for kx in range(3):
                k = ky * 3 + kx
                h2 = h2 + jnp.dot(window(ky, kx),
                                  w2_ref[k * width:(k + 1) * width, :],
                                  preferred_element_type=jnp.float32)
    h2 = jnp.maximum(h2 + b2_ref[...], 0.0)

    # ---- conv1x1 (BN folded) + bias + identity + ReLU -----------------------
    h3 = jnp.dot(h2.astype(compute_dtype), w3_ref[...],
                 preferred_element_type=jnp.float32)
    # Re-read the residual from the resident x block (not held live across the
    # three matmuls).
    x_res = x_ref[0, pl.ds(row0, tile_rows)].reshape(M, Cin)
    out = jnp.maximum(h3 + b3_ref[...] + x_res.astype(jnp.float32), 0.0)
    o_ref[0] = out.astype(o_ref.dtype)


def bottleneck_pallas_nhwc(x_nhwc, params, compute_dtype=jnp.bfloat16,
                           tile_rows=None):
    """x_nhwc: (N, H, W, Cin) -> (N, H, W, Cout).  NHWC-native entry point."""
    w1, s1, b1, w2, s2, b2, w3, s3, b3 = params
    N, H, W, Cin = x_nhwc.shape
    width = w1.shape[1]
    Cout = w3.shape[1]
    assert Cout == Cin, "identity add requires inplanes == planes * expansion"

    if tile_rows is None:
        tile_rows = _pick_tile_rows(H, W)
    assert H % tile_rows == 0, "tile_rows must divide H"
    n_tiles = H // tile_rows
    M = tile_rows * W
    Mh = (tile_rows + 2) * W
    PAD = 8
    use_im2col = width < 128

    # Fold BN scales into the conv weights; only the bias adds stay in-kernel.
    w1f = (w1 * s1).astype(compute_dtype)                            # (Cin, w)
    w2f = (w2 * s2).reshape(9 * width, width).astype(compute_dtype)  # (9w, w)
    w3f = (w3 * s3).astype(compute_dtype)                            # (w, Cout)
    b1f = b1.astype(jnp.float32).reshape(1, width)
    b2f = b2.astype(jnp.float32).reshape(1, width)
    b3f = b3.astype(jnp.float32).reshape(1, Cout)

    # Precomputed column-edge masks (no per-step iota / modulo in-kernel).
    col = jnp.arange(M, dtype=jnp.int32) % W
    lm = (col >= 1).astype(compute_dtype).reshape(M, 1)
    rm = (col < (W - 1)).astype(compute_dtype).reshape(M, 1)

    kernel = functools.partial(
        _bottleneck_kernel, H=H, W=W, Cin=Cin, width=width,
        tile_rows=tile_rows, pad=PAD, compute_dtype=compute_dtype,
        use_im2col=use_im2col)

    scratch = [pltpu.VMEM((Mh + 2 * PAD, width), compute_dtype)]
    if use_im2col:
        scratch.append(pltpu.VMEM((M, 9 * width), compute_dtype))

    # Rough per-step VMEM footprint (double-buffered blocks + scratch + temps),
    # capped at 64 MiB so the same setting is safe on v7x.
    xi = np.dtype(x_nhwc.dtype).itemsize
    ci = np.dtype(compute_dtype).itemsize
    est = (2 * H * W * Cin * xi                       # x block (dbl-buffered)
           + 2 * M * Cout * xi                        # out block
           + 2 * int(w1f.size + w2f.size + w3f.size) * ci
           + 2 * int(b1f.size + b2f.size + b3f.size) * 4
           + (Mh + 2 * PAD) * width * ci
           + (M * 9 * width * ci if use_im2col else 0)
           + 4 * M * max(width, Cout) * 4)            # f32 temps headroom
    vmem_limit = int(min(64 * 2**20, max(32 * 2**20, 2 * est)))

    out_flat = pl.pallas_call(
        kernel,
        out_shape=jax.ShapeDtypeStruct((N, H * W, Cout), x_nhwc.dtype),
        grid_spec=pltpu.PrefetchScalarGridSpec(
            num_scalar_prefetch=0,
            grid=(N, n_tiles),
            in_specs=[
                # Full (padded-free) image block, resident across the row tiles
                # of the same image; the kernel slices halo'd row windows.
                pl.BlockSpec((1, H, W, Cin), lambda n, rt: (n, 0, 0, 0)),
                pl.BlockSpec((Cin, width), lambda n, rt: (0, 0)),
                pl.BlockSpec((1, width), lambda n, rt: (0, 0)),
                pl.BlockSpec((9 * width, width), lambda n, rt: (0, 0)),
                pl.BlockSpec((1, width), lambda n, rt: (0, 0)),
                pl.BlockSpec((width, Cout), lambda n, rt: (0, 0)),
                pl.BlockSpec((1, Cout), lambda n, rt: (0, 0)),
                pl.BlockSpec((M, 1), lambda n, rt: (0, 0)),
                pl.BlockSpec((M, 1), lambda n, rt: (0, 0)),
            ],
            out_specs=pl.BlockSpec((1, M, Cout), lambda n, rt: (n, rt, 0)),
            scratch_shapes=scratch,
        ),
        compiler_params=pltpu.CompilerParams(
            dimension_semantics=("parallel", "parallel"),
            vmem_limit_bytes=vmem_limit),
    )(x_nhwc, w1f, b1f, w2f, b2f, w3f, b3f, lm, rm)

    return out_flat.reshape(N, H, W, Cout)


def bottleneck_pallas(x_nchw, params, compute_dtype=jnp.bfloat16,
                      tile_rows=None):
    """PyTorch-layout convenience wrapper: (N, Cin, H, W) -> (N, Cout, H, W).

    NOTE: the NCHW<->NHWC transposes are full HBM round trips; a model kept
    NHWC end-to-end should call bottleneck_pallas_nhwc directly.
    """
    x_nhwc = jnp.transpose(x_nchw, (0, 2, 3, 1))
    out_nhwc = bottleneck_pallas_nhwc(x_nhwc, params, compute_dtype, tile_rows)
    return jnp.transpose(out_nhwc, (0, 3, 1, 2))


def _fold_bn(gamma, beta, mean, var, eps=1e-5):
    scale = gamma / jnp.sqrt(var + eps)
    bias = beta - mean * scale
    return scale[None, :], bias[None, :]


def _reference(x_nchw, params):
    """Pure-JAX reference (f32) with unfused BN for verification."""
    w1, s1, b1, w2, s2, b2, w3, s3, b3 = params
    Cin, width = w1.shape
    Cout = w3.shape[1]
    x = jnp.transpose(x_nchw, (0, 2, 3, 1))
    dn = ("NHWC", "HWIO", "NHWC")
    h = jax.lax.conv_general_dilated(x, w1.reshape(1, 1, Cin, width),
                                     (1, 1), "VALID", dimension_numbers=dn)
    h = jnp.maximum(h * s1 + b1, 0.0)
    h = jax.lax.conv_general_dilated(h, w2, (1, 1), ((1, 1), (1, 1)),
                                     dimension_numbers=dn)
    h = jnp.maximum(h * s2 + b2, 0.0)
    h = jax.lax.conv_general_dilated(h, w3.reshape(1, 1, width, Cout),
                                     (1, 1), "VALID", dimension_numbers=dn)
    h = h * s3 + b3
    out = jnp.maximum(h + x, 0.0)
    return jnp.transpose(out, (0, 3, 1, 2))


if __name__ == "__main__":
    # Module config: Bottleneck(inplanes=16, planes=4) -> width=4, out=16
    N, inplanes, planes, H, W = 2, 16, 4, 16, 16
    width = planes        # base_width=64, groups=1
    Cout = planes * 4     # expansion

    key = jax.random.PRNGKey(0)
    keys = jax.random.split(key, 8)

    x = jax.random.normal(keys[0], (N, inplanes, H, W), jnp.float32)

    w1 = jax.random.normal(keys[1], (inplanes, width), jnp.float32) * 0.2
    w2 = jax.random.normal(keys[2], (3, 3, width, width), jnp.float32) * 0.2
    w3 = jax.random.normal(keys[3], (width, Cout), jnp.float32) * 0.2

    def bn_params(k, c):
        k1, k2, k3, k4 = jax.random.split(k, 4)
        gamma = 1.0 + 0.1 * jax.random.normal(k1, (c,), jnp.float32)
        beta = 0.1 * jax.random.normal(k2, (c,), jnp.float32)
        mean = 0.1 * jax.random.normal(k3, (c,), jnp.float32)
        var = jnp.abs(jax.random.normal(k4, (c,), jnp.float32)) + 0.5
        return _fold_bn(gamma, beta, mean, var)

    s1, b1 = bn_params(keys[4], width)
    s2, b2 = bn_params(keys[5], width)
    s3, b3 = bn_params(keys[6], Cout)

    params = (w1, s1, b1, w2, s2, b2, w3, s3, b3)
    ref = _reference(x, params)

    # f32, 2 row tiles per image (exercises the halo / seam path): tight check.
    out = bottleneck_pallas(x, params, compute_dtype=jnp.float32, tile_rows=8)
    out = jax.block_until_ready(out)
    assert out.shape == (N, Cout, H, W)
    err = jnp.max(jnp.abs(out - ref))
    assert jnp.allclose(out, ref, atol=1e-4, rtol=1e-4), f"f32 tiled err {err}"

    # f32, one tile per image (tile_rows == H): tight check.
    out1 = bottleneck_pallas(x, params, compute_dtype=jnp.float32, tile_rows=16)
    out1 = jax.block_until_ready(out1)
    err1 = jnp.max(jnp.abs(out1 - ref))
    assert jnp.allclose(out1, ref, atol=1e-4, rtol=1e-4), f"f32 whole err {err1}"

    # bf16 MXU-feed (default precision mode, f32 accumulation): loose check.
    out_bf16 = bottleneck_pallas(x, params, tile_rows=8)
    out_bf16 = jax.block_until_ready(out_bf16)
    bf16_err = jnp.max(jnp.abs(out_bf16 - ref))
    assert bf16_err < 0.3, f"bf16 max err {bf16_err}"

    print("KERNEL_OK")
</pallas_src>

<mosaic_0001>
module attributes {stable_mosaic.version = 11 : i64} {
  func.func @_bottleneck_kernel(%arg0: i32, %arg1: i32, %arg2: memref<1x16x16x16xf32, #tpu.memory_space<vmem>>, %arg3: memref<16x4xf32, #tpu.memory_space<vmem>>, %arg4: memref<1x4xf32, #tpu.memory_space<vmem>>, %arg5: memref<36x4xf32, #tpu.memory_space<vmem>>, %arg6: memref<1x4xf32, #tpu.memory_space<vmem>>, %arg7: memref<4x16xf32, #tpu.memory_space<vmem>>, %arg8: memref<1x16xf32, #tpu.memory_space<vmem>>, %arg9: memref<128x1xf32, #tpu.memory_space<vmem>>, %arg10: memref<128x1xf32, #tpu.memory_space<vmem>>, %arg11: memref<1x128x16xf32, #tpu.memory_space<vmem>>, %arg12: memref<176x4xf32, #tpu.memory_space<vmem>>, %arg13: memref<128x36xf32, #tpu.memory_space<vmem>>) attributes {dimension_semantics = [#tpu.dimension_semantics<parallel>, #tpu.dimension_semantics<parallel>], iteration_bounds = array<i64: 2, 2>, scalar_prefetch = 0 : i64, scratch_operands = 2 : i64, tpu.core_type = #tpu.core_type<tc>, window_params = [{transform_indices = @transform_0, window_bounds = array<i64: 1, 16, 16, 16>}, {pipeline_mode = #tpu.pipeline_mode<synchronous>, transform_indices = @transform_1, window_bounds = array<i64: 16, 4>}, {pipeline_mode = #tpu.pipeline_mode<synchronous>, transform_indices = @transform_2, window_bounds = array<i64: 1, 4>}, {pipeline_mode = #tpu.pipeline_mode<synchronous>, transform_indices = @transform_3, window_bounds = array<i64: 36, 4>}, {pipeline_mode = #tpu.pipeline_mode<synchronous>, transform_indices = @transform_4, window_bounds = array<i64: 1, 4>}, {pipeline_mode = #tpu.pipeline_mode<synchronous>, transform_indices = @transform_5, window_bounds = array<i64: 4, 16>}, {pipeline_mode = #tpu.pipeline_mode<synchronous>, transform_indices = @transform_6, window_bounds = array<i64: 1, 16>}, {pipeline_mode = #tpu.pipeline_mode<synchronous>, transform_indices = @transform_7, window_bounds = array<i64: 128, 1>}, {pipeline_mode = #tpu.pipeline_mode<synchronous>, transform_indices = @transform_8, window_bounds = array<i64: 128, 1>}, {transform_indices = @transform_9, window_bounds = array<i64: 1, 128, 16>}]} {
    %c8_i32 = arith.constant 8 : i32
    %0 = arith.muli %arg1, %c8_i32 : i32
    %c0 = arith.constant 0 : index
    %c0_0 = arith.constant 0 : index
    %1 = vector.load %arg3[%c0, %c0_0] : memref<16x4xf32, #tpu.memory_space<vmem>>, vector<16x4xf32>
    %c0_1 = arith.constant 0 : index
    %c0_2 = arith.constant 0 : index
    %2 = vector.load %arg4[%c0_1, %c0_2] : memref<1x4xf32, #tpu.memory_space<vmem>>, vector<1x4xf32>
    %cst = arith.constant 0.000000e+00 : f32
    %3 = vector.broadcast %cst : f32 to vector<8x4xf32>
    %cst_3 = arith.constant 0.000000e+00 : f32
    %4 = vector.broadcast %cst_3 : f32 to vector<16x4xf32>
    %c0_4 = arith.constant 0 : index
    %c0_5 = arith.constant 0 : index
    %5 = vector.load %arg12[%c0_4, %c0_5] : memref<176x4xf32, #tpu.memory_space<vmem>>, vector<8x4xf32>
    tpu.vector_store %arg12[%c0_4, %c0_5], %3 {strides = array<i32>} : memref<176x4xf32, #tpu.memory_space<vmem>>, vector<8x4xf32>,
    %c168 = arith.constant 168 : index
    %c0_6 = arith.constant 0 : index
    %6 = vector.load %arg12[%c168, %c0_6] : memref<176x4xf32, #tpu.memory_space<vmem>>, vector<8x4xf32>
    tpu.vector_store %arg12[%c168, %c0_6], %3 {strides = array<i32>} : memref<176x4xf32, #tpu.memory_space<vmem>>, vector<8x4xf32>,
    %c0_7 = arith.constant 0 : index
    %7 = arith.index_cast %0 : i32 to index
    %c0_8 = arith.constant 0 : index
    %c0_9 = arith.constant 0 : index
    %8 = vector.load %arg2[%c0_7, %7, %c0_8, %c0_9] : memref<1x16x16x16xf32, #tpu.memory_space<vmem>>, vector<1x8x16x16xf32>
    %9 = vector.shape_cast %8 : vector<1x8x16x16xf32> to vector<8x16x16xf32>
    %10 = vector.shape_cast %9 : vector<8x16x16xf32> to vector<128x16xf32>
    %cst_10 = arith.constant dense<0.000000e+00> : vector<128x4xf32>
    %11 = tpu.matmul %10, %1, %cst_10 {dimension_numbers = #tpu.dot_dimension_numbers<[1], [0], [0], [1], [0, 0, 1, 1], [], []>} : vector<128x16xf32>, vector<16x4xf32>, vector<128x4xf32> -> vector<128x4xf32>
    %12 = vector.broadcast %2 : vector<1x4xf32> to vector<128x4xf32>
    %13 = arith.addf %11, %12 : vector<128x4xf32>
    %cst_11 = arith.constant 0.000000e+00 : f32
    %14 = vector.broadcast %cst_11 : f32 to vector<128x4xf32>
    %15 = arith.maximumf %13, %14 : vector<128x4xf32>
    %c24 = arith.constant 24 : index
    %c0_12 = arith.constant 0 : index
    %16 = vector.load %arg12[%c24, %c0_12] : memref<176x4xf32, #tpu.memory_space<vmem>>, vector<128x4xf32>
    tpu.vector_store %arg12[%c24, %c0_12], %15 {strides = array<i32>} : memref<176x4xf32, #tpu.memory_space<vmem>>, vector<128x4xf32>,
    %c1_i32 = arith.constant 1 : i32
    %17 = arith.subi %0, %c1_i32 : i32
    %c0_i32 = arith.constant 0 : i32
    %18 = arith.maxsi %17, %c0_i32 : i32
    %c0_13 = arith.constant 0 : index
    %19 = arith.index_cast %18 : i32 to index
    %c0_14 = arith.constant 0 : index
    %c0_15 = arith.constant 0 : index
    %20 = vector.load %arg2[%c0_13, %19, %c0_14, %c0_15] : memref<1x16x16x16xf32, #tpu.memory_space<vmem>>, vector<1x1x16x16xf32>
    %21 = vector.shape_cast %20 : vector<1x1x16x16xf32> to vector<1x16x16xf32>
    %22 = vector.shape_cast %21 : vector<1x16x16xf32> to vector<16x16xf32>
    %cst_16 = arith.constant dense<0.000000e+00> : vector<16x4xf32>
    %23 = tpu.matmul %22, %1, %cst_16 {dimension_numbers = #tpu.dot_dimension_numbers<[1], [0], [0], [1], [0, 0, 1, 1], [], []>} : vector<16x16xf32>, vector<16x4xf32>, vector<16x4xf32> -> vector<16x4xf32>
    %24 = vector.broadcast %2 : vector<1x4xf32> to vector<16x4xf32>
    %25 = arith.addf %23, %24 : vector<16x4xf32>
    %cst_17 = arith.constant 0.000000e+00 : f32
    %26 = vector.broadcast %cst_17 : f32 to vector<16x4xf32>
    %27 = arith.maximumf %25, %26 : vector<16x4xf32>
    %c8 = arith.constant 8 : index
    %c0_18 = arith.constant 0 : index
    %28 = vector.load %arg12[%c8, %c0_18] : memref<176x4xf32, #tpu.memory_space<vmem>>, vector<16x4xf32>
    tpu.vector_store %arg12[%c8, %c0_18], %27 {strides = array<i32>} : memref<176x4xf32, #tpu.memory_space<vmem>>, vector<16x4xf32>,
    %c0_i32_19 = arith.constant 0 : i32
    %29 = arith.cmpi eq, %arg1, %c0_i32_19 : i32
    %30 = arith.extui %29 : i1 to i32
    %c0_i32_20 = arith.constant 0 : i32
    %31 = arith.cmpi ne, %30, %c0_i32_20 : i32
    scf.if %31 {
      %c8_77 = arith.constant 8 : index
      %c0_78 = arith.constant 0 : index
      %102 = vector.load %arg12[%c8_77, %c0_78] : memref<176x4xf32, #tpu.memory_space<vmem>>, vector<16x4xf32>
      tpu.vector_store %arg12[%c8_77, %c0_78], %4 {strides = array<i32>} : memref<176x4xf32, #tpu.memory_space<vmem>>, vector<16x4xf32>,
    } else {
    }
    %c8_i32_21 = arith.constant 8 : i32
    %32 = arith.addi %0, %c8_i32_21 : i32
    %c15_i32 = arith.constant 15 : i32
    %33 = arith.minsi %32, %c15_i32 : i32
    %c0_22 = arith.constant 0 : index
    %34 = arith.index_cast %33 : i32 to index
    %c0_23 = arith.constant 0 : index
    %c0_24 = arith.constant 0 : index
    %35 = vector.load %arg2[%c0_22, %34, %c0_23, %c0_24] : memref<1x16x16x16xf32, #tpu.memory_space<vmem>>, vector<1x1x16x16xf32>
    %36 = vector.shape_cast %35 : vector<1x1x16x16xf32> to vector<1x16x16xf32>
    %37 = vector.shape_cast %36 : vector<1x16x16xf32> to vector<16x16xf32>
    %cst_25 = arith.constant dense<0.000000e+00> : vector<16x4xf32>
    %38 = tpu.matmul %37, %1, %cst_25 {dimension_numbers = #tpu.dot_dimension_numbers<[1], [0], [0], [1], [0, 0, 1, 1], [], []>} : vector<16x16xf32>, vector<16x4xf32>, vector<16x4xf32> -> vector<16x4xf32>
    %39 = vector.broadcast %2 : vector<1x4xf32> to vector<16x4xf32>
    %40 = arith.addf %38, %39 : vector<16x4xf32>
    %cst_26 = arith.constant 0.000000e+00 : f32
    %41 = vector.broadcast %cst_26 : f32 to vector<16x4xf32>
    %42 = arith.maximumf %40, %41 : vector<16x4xf32>
    %c152 = arith.constant 152 : index
    %c0_27 = arith.constant 0 : index
    %43 = vector.load %arg12[%c152, %c0_27] : memref<176x4xf32, #tpu.memory_space<vmem>>, vector<16x4xf32>
    tpu.vector_store %arg12[%c152, %c0_27], %42 {strides = array<i32>} : memref<176x4xf32, #tpu.memory_space<vmem>>, vector<16x4xf32>,
    %c1_i32_28 = arith.constant 1 : i32
    %44 = arith.cmpi eq, %arg1, %c1_i32_28 : i32
    %45 = arith.extui %44 : i1 to i32
    %c0_i32_29 = arith.constant 0 : i32
    %46 = arith.cmpi ne, %45, %c0_i32_29 : i32
    scf.if %46 {
      %c152_77 = arith.constant 152 : index
      %c0_78 = arith.constant 0 : index
      %102 = vector.load %arg12[%c152_77, %c0_78] : memref<176x4xf32, #tpu.memory_space<vmem>>, vector<16x4xf32>
      tpu.vector_store %arg12[%c152_77, %c0_78], %4 {strides = array<i32>} : memref<176x4xf32, #tpu.memory_space<vmem>>, vector<16x4xf32>,
    } else {
    }
    %c0_30 = arith.constant 0 : index
    %c0_31 = arith.constant 0 : index
    %47 = vector.load %arg9[%c0_30, %c0_31] : memref<128x1xf32, #tpu.memory_space<vmem>>, vector<128x1xf32>
    %c0_32 = arith.constant 0 : index
    %c0_33 = arith.constant 0 : index
    %48 = vector.load %arg10[%c0_32, %c0_33] : memref<128x1xf32, #tpu.memory_space<vmem>>, vector<128x1xf32>
    %c7 = arith.constant 7 : index
    %c0_34 = arith.constant 0 : index
    %49 = vector.load %arg12[%c7, %c0_34] : memref<176x4xf32, #tpu.memory_space<vmem>>, vector<128x4xf32>
    %50 = vector.broadcast %47 : vector<128x1xf32> to vector<128x4xf32>
    %51 = arith.mulf %49, %50 : vector<128x4xf32>
    %c0_35 = arith.constant 0 : index
    %c0_36 = arith.constant 0 : index
    %52 = vector.load %arg13[%c0_35, %c0_36] : memref<128x36xf32, #tpu.memory_space<vmem>>, vector<128x4xf32>
    tpu.vector_store %arg13[%c0_35, %c0_36], %51 {strides = array<i32>} : memref<128x36xf32, #tpu.memory_space<vmem>>, vector<128x4xf32>,
    %c8_37 = arith.constant 8 : index
    %c0_38 = arith.constant 0 : index
    %53 = vector.load %arg12[%c8_37, %c0_38] : memref<176x4xf32, #tpu.memory_space<vmem>>, vector<128x4xf32>
    %c0_39 = arith.constant 0 : index
    %c4 = arith.constant 4 : index
    %54 = vector.load %arg13[%c0_39, %c4] : memref<128x36xf32, #tpu.memory_space<vmem>>, vector<128x4xf32>
    tpu.vector_store %arg13[%c0_39, %c4], %53 {strides = array<i32>} : memref<128x36xf32, #tpu.memory_space<vmem>>, vector<128x4xf32>,
    %c9 = arith.constant 9 : index
    %c0_40 = arith.constant 0 : index
    %55 = vector.load %arg12[%c9, %c0_40] : memref<176x4xf32, #tpu.memory_space<vmem>>, vector<128x4xf32>
    %56 = vector.broadcast %48 : vector<128x1xf32> to vector<128x4xf32>
    %57 = arith.mulf %55, %56 : vector<128x4xf32>
    %c0_41 = arith.constant 0 : index
    %c8_42 = arith.constant 8 : index
    %58 = vector.load %arg13[%c0_41, %c8_42] : memref<128x36xf32, #tpu.memory_space<vmem>>, vector<128x4xf32>
    tpu.vector_store %arg13[%c0_41, %c8_42], %57 {strides = array<i32>} : memref<128x36xf32, #tpu.memory_space<vmem>>, vector<128x4xf32>,
    %c23 = arith.constant 23 : index
    %c0_43 = arith.constant 0 : index
    %59 = vector.load %arg12[%c23, %c0_43] : memref<176x4xf32, #tpu.memory_space<vmem>>, vector<128x4xf32>
    %60 = vector.broadcast %47 : vector<128x1xf32> to vector<128x4xf32>
    %61 = arith.mulf %59, %60 : vector<128x4xf32>
    %c0_44 = arith.constant 0 : index
    %c12 = arith.constant 12 : index
    %62 = vector.load %arg13[%c0_44, %c12] : memref<128x36xf32, #tpu.memory_space<vmem>>, vector<128x4xf32>
    tpu.vector_store %arg13[%c0_44, %c12], %61 {strides = array<i32>} : memref<128x36xf32, #tpu.memory_space<vmem>>, vector<128x4xf32>,
    %c24_45 = arith.constant 24 : index
    %c0_46 = arith.constant 0 : index
    %63 = vector.load %arg12[%c24_45, %c0_46] : memref<176x4xf32, #tpu.memory_space<vmem>>, vector<128x4xf32>
    %c0_47 = arith.constant 0 : index
    %c16 = arith.constant 16 : index
    %64 = vector.load %arg13[%c0_47, %c16] : memref<128x36xf32, #tpu.memory_space<vmem>>, vector<128x4xf32>
    tpu.vector_store %arg13[%c0_47, %c16], %63 {strides = array<i32>} : memref<128x36xf32, #tpu.memory_space<vmem>>, vector<128x4xf32>,
    %c25 = arith.constant 25 : index
    %c0_48 = arith.constant 0 : index
    %65 = vector.load %arg12[%c25, %c0_48] : memref<176x4xf32, #tpu.memory_space<vmem>>, vector<128x4xf32>
    %66 = vector.broadcast %48 : vector<128x1xf32> to vector<128x4xf32>
    %67 = arith.mulf %65, %66 : vector<128x4xf32>
    %c0_49 = arith.constant 0 : index
    %c20 = arith.constant 20 : index
    %68 = vector.load %arg13[%c0_49, %c20] : memref<128x36xf32, #tpu.memory_space<vmem>>, vector<128x4xf32>
    tpu.vector_store %arg13[%c0_49, %c20], %67 {strides = array<i32>} : memref<128x36xf32, #tpu.memory_space<vmem>>, vector<128x4xf32>,
    %c39 = arith.constant 39 : index
    %c0_50 = arith.constant 0 : index
    %69 = vector.load %arg12[%c39, %c0_50] : memref<176x4xf32, #tpu.memory_space<vmem>>, vector<128x4xf32>
    %70 = vector.broadcast %47 : vector<128x1xf32> to vector<128x4xf32>
    %71 = arith.mulf %69, %70 : vector<128x4xf32>
    %c0_51 = arith.constant 0 : index
    %c24_52 = arith.constant 24 : index
    %72 = vector.load %arg13[%c0_51, %c24_52] : memref<128x36xf32, #tpu.memory_space<vmem>>, vector<128x4xf32>
    tpu.vector_store %arg13[%c0_51, %c24_52], %71 {strides = array<i32>} : memref<128x36xf32, #tpu.memory_space<vmem>>, vector<128x4xf32>,
    %c40 = arith.constant 40 : index
    %c0_53 = arith.constant 0 : index
    %73 = vector.load %arg12[%c40, %c0_53] : memref<176x4xf32, #tpu.memory_space<vmem>>, vector<128x4xf32>
    %c0_54 = arith.constant 0 : index
    %c28 = arith.constant 28 : index
    %74 = vector.load %arg13[%c0_54, %c28] : memref<128x36xf32, #tpu.memory_space<vmem>>, vector<128x4xf32>
    tpu.vector_store %arg13[%c0_54, %c28], %73 {strides = array<i32>} : memref<128x36xf32, #tpu.memory_space<vmem>>, vector<128x4xf32>,
    %c41 = arith.constant 41 : index
    %c0_55 = arith.constant 0 : index
    %75 = vector.load %arg12[%c41, %c0_55] : memref<176x4xf32, #tpu.memory_space<vmem>>, vector<128x4xf32>
    %76 = vector.broadcast %48 : vector<128x1xf32> to vector<128x4xf32>
    %77 = arith.mulf %75, %76 : vector<128x4xf32>
    %c0_56 = arith.constant 0 : index
    %c32 = arith.constant 32 : index
    %78 = vector.load %arg13[%c0_56, %c32] : memref<128x36xf32, #tpu.memory_space<vmem>>, vector<128x4xf32>
    tpu.vector_store %arg13[%c0_56, %c32], %77 {strides = array<i32>} : memref<128x36xf32, #tpu.memory_space<vmem>>, vector<128x4xf32>,
    %c0_57 = arith.constant 0 : index
    %c0_58 = arith.constant 0 : index
    %79 = vector.load %arg13[%c0_57, %c0_58] : memref<128x36xf32, #tpu.memory_space<vmem>>, vector<128x36xf32>
    %c0_59 = arith.constant 0 : index
    %c0_60 = arith.constant 0 : index
    %80 = vector.load %arg5[%c0_59, %c0_60] : memref<36x4xf32, #tpu.memory_space<vmem>>, vector<36x4xf32>
    %cst_61 = arith.constant dense<0.000000e+00> : vector<128x4xf32>
    %81 = tpu.matmul %79, %80, %cst_61 {dimension_numbers = #tpu.dot_dimension_numbers<[1], [0], [0], [1], [0, 0, 1, 1], [], []>} : vector<128x36xf32>, vector<36x4xf32>, vector<128x4xf32> -> vector<128x4xf32>
    %c0_62 = arith.constant 0 : index
    %c0_63 = arith.constant 0 : index
    %82 = vector.load %arg6[%c0_62, %c0_63] : memref<1x4xf32, #tpu.memory_space<vmem>>, vector<1x4xf32>
    %83 = vector.broadcast %82 : vector<1x4xf32> to vector<128x4xf32>
    %84 = arith.addf %81, %83 : vector<128x4xf32>
    %cst_64 = arith.constant 0.000000e+00 : f32
    %85 = vector.broadcast %cst_64 : f32 to vector<128x4xf32>
    %86 = arith.maximumf %84, %85 : vector<128x4xf32>
    %c0_65 = arith.constant 0 : index
    %c0_66 = arith.constant 0 : index
    %87 = vector.load %arg7[%c0_65, %c0_66] : memref<4x16xf32, #tpu.memory_space<vmem>>, vector<4x16xf32>
    %cst_67 = arith.constant dense<0.000000e+00> : vector<128x16xf32>
    %88 = tpu.matmul %86, %87, %cst_67 {dimension_numbers = #tpu.dot_dimension_numbers<[1], [0], [0], [1], [0, 0, 1, 1], [], []>} : vector<128x4xf32>, vector<4x16xf32>, vector<128x16xf32> -> vector<128x16xf32>
    %c0_68 = arith.constant 0 : index
    %89 = arith.index_cast %0 : i32 to index
    %c0_69 = arith.constant 0 : index
    %c0_70 = arith.constant 0 : index
    %90 = vector.load %arg2[%c0_68, %89, %c0_69, %c0_70] : memref<1x16x16x16xf32, #tpu.memory_space<vmem>>, vector<1x8x16x16xf32>
    %91 = vector.shape_cast %90 : vector<1x8x16x16xf32> to vector<8x16x16xf32>
    %92 = vector.shape_cast %91 : vector<8x16x16xf32> to vector<128x16xf32>
    %c0_71 = arith.constant 0 : index
    %c0_72 = arith.constant 0 : index
    %93 = vector.load %arg8[%c0_71, %c0_72] : memref<1x16xf32, #tpu.memory_space<vmem>>, vector<1x16xf32>
    %94 = vector.broadcast %93 : vector<1x16xf32> to vector<128x16xf32>
    %95 = arith.addf %88, %94 : vector<128x16xf32>
    %96 = arith.addf %95, %92 : vector<128x16xf32>
    %cst_73 = arith.constant 0.000000e+00 : f32
    %97 = vector.broadcast %cst_73 : f32 to vector<128x16xf32>
    %98 = arith.maximumf %96, %97 : vector<128x16xf32>
    %c0_74 = arith.constant 0 : index
    %c0_75 = arith.constant 0 : index
    %c0_76 = arith.constant 0 : index
    %99 = vector.load %arg11[%c0_74, %c0_75, %c0_76] : memref<1x128x16xf32, #tpu.memory_space<vmem>>, vector<1x128x16xf32>
    %100 = vector.shape_cast %99 : vector<1x128x16xf32> to vector<128x16xf32>
    %101 = vector.shape_cast %98 : vector<128x16xf32> to vector<1x128x16xf32>
    tpu.vector_store %arg11[%c0_74, %c0_75, %c0_76], %101 {strides = array<i32>} : memref<1x128x16xf32, #tpu.memory_space<vmem>>, vector<1x128x16xf32>,
    return
  }
  func.func @transform_0(%arg0: i32, %arg1: i32) -> (i32, i32, i32, i32) {
    %c0_i32 = arith.constant 0 : i32
    %c0_i32_0 = arith.constant 0 : i32
    %c0_i32_1 = arith.constant 0 : i32
    %c0_i32_2 = arith.constant 0 : i32
    return %arg0, %c0_i32, %c0_i32_0, %c0_i32_1 : i32, i32, i32, i32
  }
  func.func @transform_1(%arg0: i32, %arg1: i32) -> (i32, i32) {
    %c0_i32 = arith.constant 0 : i32
    %c0_i32_0 = arith.constant 0 : i32
    %c0_i32_1 = arith.constant 0 : i32
    return %c0_i32, %c0_i32_0 : i32, i32
  }
  func.func @transform_2(%arg0: i32, %arg1: i32) -> (i32, i32) {
    %c0_i32 = arith.constant 0 : i32
    %c0_i32_0 = arith.constant 0 : i32
    %c0_i32_1 = arith.constant 0 : i32
    return %c0_i32, %c0_i32_0 : i32, i32
  }
  func.func @transform_3(%arg0: i32, %arg1: i32) -> (i32, i32) {
    %c0_i32 = arith.constant 0 : i32
    %c0_i32_0 = arith.constant 0 : i32
    %c0_i32_1 = arith.constant 0 : i32
    return %c0_i32, %c0_i32_0 : i32, i32
  }
  func.func @transform_4(%arg0: i32, %arg1: i32) -> (i32, i32) {
    %c0_i32 = arith.constant 0 : i32
    %c0_i32_0 = arith.constant 0 : i32
    %c0_i32_1 = arith.constant 0 : i32
    return %c0_i32, %c0_i32_0 : i32, i32
  }
  func.func @transform_5(%arg0: i32, %arg1: i32) -> (i32, i32) {
    %c0_i32 = arith.constant 0 : i32
    %c0_i32_0 = arith.constant 0 : i32
    %c0_i32_1 = arith.constant 0 : i32
    return %c0_i32, %c0_i32_0 : i32, i32
  }
  func.func @transform_6(%arg0: i32, %arg1: i32) -> (i32, i32) {
    %c0_i32 = arith.constant 0 : i32
    %c0_i32_0 = arith.constant 0 : i32
    %c0_i32_1 = arith.constant 0 : i32
    return %c0_i32, %c0_i32_0 : i32, i32
  }
  func.func @transform_7(%arg0: i32, %arg1: i32) -> (i32, i32) {
    %c0_i32 = arith.constant 0 : i32
    %c0_i32_0 = arith.constant 0 : i32
    %c0_i32_1 = arith.constant 0 : i32
    return %c0_i32, %c0_i32_0 : i32, i32
  }
  func.func @transform_8(%arg0: i32, %arg1: i32) -> (i32, i32) {
    %c0_i32 = arith.constant 0 : i32
    %c0_i32_0 = arith.constant 0 : i32
    %c0_i32_1 = arith.constant 0 : i32
    return %c0_i32, %c0_i32_0 : i32, i32
  }
  func.func @transform_9(%arg0: i32, %arg1: i32) -> (i32, i32, i32) {
    %c0_i32 = arith.constant 0 : i32
    %c0_i32_0 = arith.constant 0 : i32
    return %arg0, %arg1, %c0_i32 : i32, i32, i32
  }
}

</mosaic_0001>

<bundles_post_ra>
// kernel: tpu_custom_call.1
= control target key start
LH: loop header
LB: loop body
LE: loop exit
PB: predicated region body
PF: predicated region fallthrough
CT: control target
= control target key end

     0   :  { %s4012_s0 = inlined_call_operand.hbm [shape: f32[2,16,16,16], index: 0, kind: input, shape index: {}]   ;;  %s4013_s1 = inlined_call_operand.vmem [shape: f32[16,4], index: 1, kind: input, shape index: {}]   ;;  %s4014_s2 = inlined_call_operand.vmem [shape: f32[1,4], index: 2, kind: input, shape index: {}]   ;;  %s4015_s3 = inlined_call_operand.vmem [shape: f32[36,4], index: 3, kind: input, shape index: {}]   ;;  %s4016_s4 = inlined_call_operand.vmem [shape: f32[1,4], index: 4, kind: input, shape index: {}]   ;;  %s4017_s5 = inlined_call_operand.vmem [shape: f32[4,16], index: 5, kind: input, shape index: {}]   ;;  %s4018_s6 = inlined_call_operand.vmem [shape: f32[1,16], index: 6, kind: input, shape index: {}]   ;;  %s4019_s7 = inlined_call_operand.vmem [shape: f32[128,1], index: 7, kind: input, shape index: {}]   ;;  %s4020_s8 = inlined_call_operand.vmem [shape: f32[128,1], index: 8, kind: input, shape index: {}]   ;;  %s4021_s9 = inlined_call_operand.vmem [shape: f32[2,256,16], index: 9, kind: output, shape index: {}]  }
   0x1   :  { %4023 = sst [smem:[#allocation9_spill]] %s4012_s0 }
   0x2   :  { %14 = vsyncpa [#allocation5], 0 }
   0x3   :  { %16 = vsyncpa [#allocation5 + $0x1], 0  ;;  %s3054_s30 = smov 0   ;;  %s3056_s10 = smov 0  }
   0x4   :  { %s3058_s11 = smov 0   ;;  %s3060_s12 = smov 0  }
   0x5   :  { %s3062_s13 = smov 0   ;;  %s3064_s14 = smov 0  }
   0x6   :  { %s3066_s15 = smov 0   ;;  %s3068_s16 = smov 0  }
   0x7 LB: > { %s2536_s17 = sadd.s32 4294967295, %s2987_s16   ;;  %s31_s18 = sadd.s32 1, %s2979_s14  ;;  %s2987_s16 = sphi %s3068_s16, %s22_s16   ;;  %s2983_s15 = sphi %s3066_s15, %s4038_s15   ;;  %s2979_s14 = sphi %s3064_s14, %s4037_s14   ;;  %s2975_s13 = sphi %s3062_s13, %s4036_s13   ;;  %s2971_s12 = sphi %s3060_s12, %s4035_s12   ;;  %s2967_s11 = sphi %s3058_s11, %s4034_s11   ;;  %s2963_s10 = sphi %s3056_s10, %s4033_s10   ;;  %s2959_s30 = sphi %s3054_s30, %s4032_s30  }
   0x8   : > { %p32_p0 = scmp.ge.s32.totalorder %s31_s18, 2  ;;  %s34_s19 = sadd.s32 1, %s2983_s15 }
   0x9   : > { %s41_s20 = sadd.s32 1, %s2967_s11  ;;  %p48_p1 = scmp.ne.s32.totalorder %s2967_s11, %s2963_s10 }
   0xa   : > { %s4040_s18 = smov (%p32_p0, %s31_s18), 0  ;;  %s4042_s19 = smov (!%p32_p0, %s34_s19), %s2983_s15 }
   0xb   : > { %4024 = sst [smem:[#allocation7_spill]] %s4040_s18  ;;  %p49_p2 = scmp.eq.s32.totalorder %s2987_s16, 0 }
   0xc   : > { %p54_p3 = scmp.ne.s32.totalorder %s2963_s10, %s2959_s30  ;;  %p36_p4 = scmp.ge.s32.totalorder %s4042_s19, 2 }
   0xd   : > { %p55_p5 = scmp.eq.s32.totalorder %s2536_s17, 0  ;;  %p3103_p6 = por %p49_p2, %p48_p1 }
   0xe   : > { %s4044_s19 = smov (%p36_p4, %s4042_s19), 0  ;;  %p2810_p8 = scmp.lt.s32.totalorder %s2987_s16, 4 }
   0xf   : > { %4026 = sst [smem:[#allocation8_spill]] %s4044_s19  ;;  %p3109_p7 = por %p55_p5, %p54_p3 }
  0x10   : > { %s38_s23 = ssub.s32 %s2983_s15, %s4044_s19  ;;  %s298_s24 = sand.u32 1, %s2967_s11  }
  0x11   : > { %p39_p9 = scmp.eq.s32.totalorder %s38_s23, 0  ;;  %s2540_s25 = sshll.u32 %s298_s24, 8 }
  0x12   : > { %s2614_s26 = sshll.u32 %s2983_s15, 12  ;;  %s4028_s0 = sld [smem:[#allocation9_spill]] }
  0x13   : > { %s3119_s27 = scalar_select %p39_p9, %s2967_s11, %s41_s20  }
  0x14   : > { %s302_s17 = scalar_lea.vmem [#allocation4], %s2540_s25  ;;  %p3128_p10 = pnand %p2810_p8, %p3103_p6 }
  0x15   : > { %s309_s18 = sshll.u32 %s302_s17, 4  ;;  %s3134_s20 = scalar_lea.sflag [#allocation5], %s298_s24  ;;  %s3132_s18 = int_to_ptr.vmem [resolvable:$true] %s309_s18 }
  0x16   : > { %p2893_p12 = pneg %p3128_p10 }
  0x18   : > { %s3124_s30 = scalar_lea.hbm %s4028_s0, %s2614_s26  ;;  %s2896_s26 = scalar_lea.hbm %s4028_s0, 8192 }
  0x19   : > { %s2891_s23 = scalar_lea.hbm %s3124_s30, 4096  ;;  %p2897_p1 = scmp.lt.u32.totalorder %s3124_s30, %s4028_s0 }
  0x1a   : > { %p2892_p11 = scmp.ne.s32.totalorder %s3124_s30, %s2891_s23  ;;  %p2898_p2 = scmp.lt.u32.totalorder %s2896_s26, %s2891_s23 }
  0x1b   : > { %p2900_p4 = scmp.lt.u32.totalorder %s2891_s23, %s3124_s30 }
  0x1c   : > { %p2894_p13 = pnand %p2893_p12, %p2892_p11  ;;  %p2899_p3 = por %p2898_p2, %p2897_p1 }
  0x1e   : > { %p2895_p0 = pneg %p2894_p13  ;;  %p2901_p5 = por %p2900_p4, %p2899_p3 }
  0x20   : > { %p2902_p6 = pnand %p2901_p5, %p2895_p0 }
  0x22   : > { %2905 = shalt.err (!%p2902_p6)
}
  0x23   : > { %s2906_s24 = scalar_lea.vmem %s3132_s18, 4096  ;;  %s2989_s17 = smov [#allocation4]  }
  0x24   : > { %p2907_p8 = scmp.ne.s32.totalorder %s3132_s18, %s2906_s24  ;;  %s2911_s25 = sshll.u32 %s2989_s17, 4  ;;  %s2912_s25 = int_to_ptr.vmem [resolvable:$false] %s2911_s25 }
  0x25   : > { %s2913_s21 = scalar_lea.vmem %s2912_s25, 8192  ;;  %p2914_p13 = scmp.lt.s32.totalorder %s3132_s18, %s2912_s25 }
  0x26   : > { %p2909_p9 = pnand %p2907_p8, %p2893_p12  ;;  %p2915_p1 = scmp.lt.s32.totalorder %s2913_s21, %s2906_s24 }
  0x28   : > { %p2910_p11 = pneg %p2909_p9  ;;  %p2916_p2 = por %p2915_p1, %p2914_p13 }
  0x2a   : > { %p2917_p3 = pnand %p2916_p2, %p2910_p11 }
  0x2c   : > { %2920 = shalt.err (!%p2917_p3)
}
  0x2d   : > { %s2990_s23 = smov 128   ;;  %s2991_s26 = smov 8  }
  0x2e   : > { %2809 = dma.hbm_to_vmem [thread:$0]  (!%p3128_p10), %s3124_s30, 4096, %s3132_s18, %s3134_s20, %s2990_s23, %s2990_s23, %s2991_s26  }
  0x2f   : > { %p2543_p12 = scmp.ge.s32.totalorder %s2987_s16, 1  ;;  %p317_p0 = scmp.lt.s32.totalorder %s2987_s16, 5 }
  0x31   : > { %p318_p4 = pnand %p2543_p12, %p317_p0 }
  0x32   : > { %s323_s28 = sand.u32 (!%p318_p4), 1, %s2963_s10  }
  0x33   : > { %321 = sbr.rel (%p318_p4) target bundleno = 1450 (0x5aa), region = 56  ;;  %s2544_s29 = sshll.u32 (!%p318_p4), %s323_s28, 8 }
  0x34   : > { %s324_s24 = scalar_lea.sflag (!%p318_p4), [#allocation5], %s323_s28  ;;  %s3165_s17 = scalar_lea.vmem (!%p318_p4), [#allocation4], %s2544_s29 }
  0x3a   : > { %2954 = dma.done.wait (%p3109_p7), %s324_s24, 4096  }
  0x3b   : > { %2956 = vsyncadd (%p3109_p7), %s324_s24, 4294963200  ;;  %s2545_s18 = sshll.u32 %s2971_s12, 4  ;;  %p367_p10 = scmp.lt.s32.totalorder %s2975_s13, 1  ;;  %vm380_vm0 = vcmask 31744   ;;  %v2992_v0 = vmov 0.0   ;;  %vm407_vm1 = vcmask 130048  }
  0x3c   : > { %p369_p5 = scmp.lt.s32.totalorder %s2545_s18, 31  ;;  %s2615_s19 = sshll.u32 %s2971_s12, 7  ;;  %381 = vst.msk [vmem:[#allocation2] sm:$0xff] %vm380_vm0, %v2992_v0  ;;  %382 = vst.msk [vmem:[#allocation2 + $0xa8] sm:$0xff] %vm380_vm0, %v2992_v0  ;;  %v377_v1 = vld [vmem:[%s4013_s1] sm:$0xff]  ;;  %v378_v2 = vld [vmem:[%s4013_s1 + $0x8] sm:$0xff] }
  0x3d   : > { %s4046_s13 = smov (!%p367_p10, %s2975_s13), 1  ;;  %s3178_s30 = scalar_lea.vmem %s3165_s17, %s2615_s19 [#allocation4]  ;;  %v3195_v4 = vpack.c.bf16 %v378_v2, %v377_v1  ;;  %v3240_v22 = vld [vmem:[%s4014_s2] ss:$0 sm:$0xff] }
  0x3e   : > { %s4048_s18 = smov (!%p369_p5, %s2545_s18), 31  ;;  %s2546_s22 = sshll.u32 %s4046_s13, 5  ;;  %v385_v3 = vld [vmem:[%s3178_s30] sm:$0xff]  ;;  %v386_v6 = vld [vmem:[%s3178_s30 + $0x8] sm:$0xff]  ;;  %v387_v8 = vld [vmem:[%s3178_s30 + $0x10] sm:$0xff] }
  0x3f   : > { %s372_s20 = sadd.s32 %s2546_s22, %s4048_s18  ;;  %s2548_s25 = sshll.u32 %s2971_s12, 3  ;;  %2684 = vmatprep.mubr.msk.f32.mxu0 %vm407_vm1, %v385_v3  ;;  %v397_v5 = vld [vmem:[%s3178_s30 + $0x60] sm:$0xff]  ;;  %2783 = vmatprep.subr.bf16.mxu0 %v3195_v4  ;;  %v398_v7 = vld [vmem:[%s3178_s30 + $0x68] sm:$0xff]  ;;  %v399_v9 = vld [vmem:[%s3178_s30 + $0x70] sm:$0xff] }
  0x40   : > { %s2547_s21 = sshll.u32 %s372_s20, 3  ;;  %s2567_s23 = sadd.s32 4294967295, %s2548_s25  ;;  %2802 = vmatprep.subr.bf16.mxu1 %v3195_v4  ;;  %2785 = vmatpush3.bf16.msra.mxu0 %v3195_v4  ;;  %v388_v10 = vld [vmem:[%s3178_s30 + $0x18] sm:$0xff]  ;;  %v389_v12 = vld [vmem:[%s3178_s30 + $0x20] sm:$0xff]  ;;  %v390_v14 = vld [vmem:[%s3178_s30 + $0x28] sm:$0xff] }
  0x41   : > { %s3186_s29 = scalar_lea.vmem %s4021_s9, %s2547_s21  ;;  %p634_p7 = scmp.gt.s32.totalorder %s2567_s23, 0  ;;  %2803 = vmatpush3.bf16.msra.mxu1 %v3195_v4  ;;  %2702 = vmatprep.mubr.msk.f32.mxu1 %vm407_vm1, %v397_v5  ;;  %v400_v11 = vld [vmem:[%s3178_s30 + $0x78] sm:$0xff]  ;;  %v391_v16 = vld [vmem:[%s3178_s30 + $0x30] sm:$0xff]  ;;  %v393_v18 = vld [vmem:[%s3178_s30 + $0x40] sm:$0xff] }
  0x42   : > { %2787 = vmatprep.subr.bf16.mxu1 %v3195_v4  ;;  %v392_v17 = vld [vmem:[%s3178_s30 + $0x38] sm:$0xff]  ;;  %v394_v19 = vld [vmem:[%s3178_s30 + $0x48] sm:$0xff]  ;;  %v395_v20 = vld [vmem:[%s3178_s30 + $0x50] sm:$0xff]  ;;  %p2571_p6 = scmp.ne.s32.totalorder %s2971_s12, 0 }
  0x43   : > { %s4050_s23 = smov (!%p634_p7, %s2567_s23), 0  ;;  %2685 = vmatmul.mubr.msk.f32.vlgmr.msra.gmra.mrb[0].mxu0 %vm407_vm1, %v386_v6  ;;  %v396_v21 = vld [vmem:[%s3178_s30 + $0x58] sm:$0xff] }
  0x44   : > { %s2568_s0 = sshll.u32 %s4050_s23, 4  ;;  %2703 = vmatmul.mubr.msk.f32.vlgmr.msra.gmra.mrb[0].mxu1 %vm407_vm1, %v398_v7  ;;  %2687 = vmatprep.mubr.msk.f32.mxu0 %vm407_vm1, %v387_v8 }
  0x45   : > { %s637_s18 = scalar_lea.vmem %s3165_s17, %s2568_s0 [#allocation4]  ;;  %2789 = vmatpush3.bf16.msra.mxu1 %v3195_v4  ;;  %2705 = vmatprep.mubr.msk.f32.mxu1 %vm407_vm1, %v399_v9 }
  0x46   : > { %v638_v13 = vld [vmem:[%s637_s18] sm:$0xff]  ;;  %v639_v15 = vld [vmem:[%s637_s18 + $0x8] sm:$0xff] }
  0x47   : > { %2688 = vmatmul.mubr.msk.f32.gmra.mrb[2].mxu0 %vm407_vm1, %v388_v10 }
  0x48   : > { %2706 = vmatmul.mubr.msk.f32.gmra.mrb[2].mxu1 %vm407_vm1, %v400_v11  ;;  %2690 = vmatprep.mubr.msk.f32.mxu0 %vm407_vm1, %v389_v12 }
  0x49   : > { %2712 = vmatprep.mubr.msk.f32.mxu1 %vm407_vm1, %v638_v13 }
  0x4b   : > { %2691 = vmatmul.mubr.msk.f32.gmra.mrb[4].mxu0 %vm407_vm1, %v390_v14  ;;  %v2993_v14 = vmov (!%p2571_p6), 0.0  }
  0x4c   : > { %2713 = vmatmul.mubr.msk.f32.vlgmr.msra.gmra.mrb[4].mxu1 %vm407_vm1, %v639_v15  ;;  %2693 = vmatprep.mubr.msk.f32.mxu0 %vm407_vm1, %v391_v16 }
  0x4f   : > { %2694 = vmatmul.mubr.msk.f32.gmra.mrb[6].mxu0 %vm407_vm1, %v392_v17 }
  0x50   : > { %2696 = vmatprep.mubr.msk.f32.mxu0 %vm407_vm1, %v393_v18 }
  0x53   : > { %2697 = vmatmul.mubr.msk.f32.gmra.mrb[8].mxu0 %vm407_vm1, %v394_v19 }
  0x54   : > { %2699 = vmatprep.mubr.msk.f32.mxu0 %vm407_vm1, %v395_v20 }
  0x57   : > { %2700 = vmatmul.mubr.msk.f32.gmra.mrb[10].mxu0 %vm407_vm1, %v396_v21 }
 0x116   : > { %v2686_v23 = vpop.f32.mrb[0].mxu0 }
 0x117   : > { %v2704_v24 = vpop.f32.mrb[0].mxu1  ;;  %v528_v25 = vadd.f32 %v2686_v23, %v3240_v22  ;;  %v522_v26 = vpop.f32.mrb[1].mxu0 }
 0x118   : > { %v588_v27 = vadd.f32 %v2704_v24, %v3240_v22  ;;  %v582_v28 = vpop.f32.mrb[1].mxu1  ;;  %v523_v29 = vadd.f32 %v3240_v22, %v522_v26 }
 0x119   : > { %v583_v30 = vadd.f32 %v3240_v22, %v582_v28  ;;  %v602_v31 = vmax.f32 %v528_v25, 0.0 }
 0x11a   : > { %v614_v32 = vmax.f32 %v588_v27, 0.0  ;;  %v601_v33 = vmax.f32 %v523_v29, 0.0  ;;  %v2689_v34 = vpop.f32.mrb[2].mxu0 }
 0x11b   : > { %v613_v35 = vmax.f32 %v583_v30, 0.0  ;;  %v2707_v36 = vpop.f32.mrb[2].mxu1  ;;  %618 = vst.msk [vmem:[#allocation2 + $0x20] sm:$0xff] %vm380_vm0, %v602_v31  ;;  %v538_v37 = vadd.f32 %v2689_v34, %v3240_v22  ;;  %v532_v38 = vpop.f32.mrb[3].mxu0 }
 0x11c   : > { %630 = vst.msk [vmem:[#allocation2 + $0x80] sm:$0xff] %vm380_vm0, %v614_v32  ;;  %v598_v39 = vadd.f32 %v2707_v36, %v3240_v22  ;;  %v592_v40 = vpop.f32.mrb[3].mxu1  ;;  %617 = vst.msk [vmem:[#allocation2 + $0x18] sm:$0xff] %vm380_vm0, %v601_v33  ;;  %v533_v41 = vadd.f32 %v3240_v22, %v532_v38 }
 0x11d   : > { %629 = vst.msk [vmem:[#allocation2 + $0x78] sm:$0xff] %vm380_vm0, %v613_v35  ;;  %v593_v42 = vadd.f32 %v3240_v22, %v592_v40  ;;  %v604_v43 = vmax.f32 %v538_v37, 0.0 }
 0x11e   : > { %v616_v44 = vmax.f32 %v598_v39, 0.0  ;;  %v603_v45 = vmax.f32 %v533_v41, 0.0  ;;  %v2692_v46 = vpop.f32.mrb[4].mxu0 }
 0x11f   : > { %v615_v47 = vmax.f32 %v593_v42, 0.0  ;;  %v2714_v48 = vpop.f32.mrb[4].mxu1  ;;  %620 = vst.msk [vmem:[#allocation2 + $0x30] sm:$0xff] %vm380_vm0, %v604_v43  ;;  %v548_v49 = vadd.f32 %v2692_v46, %v3240_v22  ;;  %v542_v50 = vpop.f32.mrb[5].mxu0 }
 0x120   : > { %632 = vst.msk [vmem:[#allocation2 + $0x90] sm:$0xff] %vm380_vm0, %v616_v44  ;;  %v718_v51 = vadd.f32 %v2714_v48, %v3240_v22  ;;  %v712_v52 = vpop.f32.mrb[5].mxu1  ;;  %619 = vst.msk [vmem:[#allocation2 + $0x28] sm:$0xff] %vm380_vm0, %v603_v45  ;;  %v543_v53 = vadd.f32 %v3240_v22, %v542_v50 }
 0x121   : > { %631 = vst.msk [vmem:[#allocation2 + $0x88] sm:$0xff] %vm380_vm0, %v615_v47  ;;  %v713_v54 = vadd.f32 %v3240_v22, %v712_v52  ;;  %v606_v55 = vmax.f32 %v548_v49, 0.0 }
 0x122   : > { %v722_v56 = vmax.f32 %v718_v51, 0.0  ;;  %v605_v57 = vmax.f32 %v543_v53, 0.0  ;;  %v2695_v58 = vpop.f32.mrb[6].mxu0 }
 0x123   : > { %v721_v59 = vmax.f32 %v713_v54, 0.0  ;;  %622 = vst.msk [vmem:[#allocation2 + $0x40] sm:$0xff] %vm380_vm0, %v606_v55  ;;  %v558_v60 = vadd.f32 %v2695_v58, %v3240_v22  ;;  %v552_v61 = vpop.f32.mrb[7].mxu0 }
 0x124   : > { %724 = vst.msk [vmem:[#allocation2 + $0x10] sm:$0xff] %vm380_vm0, %v722_v56  ;;  %621 = vst.msk [vmem:[#allocation2 + $0x38] sm:$0xff] %vm380_vm0, %v605_v57  ;;  %v553_v62 = vadd.f32 %v3240_v22, %v552_v61 }
 0x125   : > { %723 = vst.msk [vmem:[#allocation2 + $0x8] sm:$0xff] %vm380_vm0, %v721_v59  ;;  %v608_v63 = vmax.f32 %v558_v60, 0.0  ;;  %730 = vst.msk [vmem:[#allocation2 + $0x10] sm:$0xff] (!%p2571_p6), %vm380_vm0, %v2993_v14 }
 0x126   : > { %v607_v0 = vmax.f32 %v553_v62, 0.0  ;;  %v2698_v1 = vpop.f32.mrb[8].mxu0  ;;  %729 = vst.msk [vmem:[#allocation2 + $0x8] sm:$0xff] (!%p2571_p6), %vm380_vm0, %v2993_v14 }
 0x127   : > { %624 = vst.msk [vmem:[#allocation2 + $0x50] sm:$0xff] %vm380_vm0, %v608_v63  ;;  %v568_v2 = vadd.f32 %v2698_v1, %v3240_v22  ;;  %v562_v3 = vpop.f32.mrb[9].mxu0 }
 0x128   : > { %623 = vst.msk [vmem:[#allocation2 + $0x48] sm:$0xff] %vm380_vm0, %v607_v0  ;;  %v563_v5 = vadd.f32 %v3240_v22, %v562_v3 }
 0x129   : > { %v610_v6 = vmax.f32 %v568_v2, 0.0 }
 0x12a   : > { %v609_v7 = vmax.f32 %v563_v5, 0.0  ;;  %v2701_v8 = vpop.f32.mrb[10].mxu0  ;;  %728 = sbr.rel (%p2571_p6) target bundleno = 305 (0x131), region = 64 }
 0x12b   : > { %626 = vst.msk [vmem:[#allocation2 + $0x60] sm:$0xff] %vm380_vm0, %v610_v6  ;;  %v578_v9 = vadd.f32 %v2701_v8, %v3240_v22  ;;  %v572_v10 = vpop.f32.mrb[11].mxu0 }
 0x12c   : > { %625 = vst.msk [vmem:[#allocation2 + $0x58] sm:$0xff] %vm380_vm0, %v609_v7  ;;  %v573_v11 = vadd.f32 %v3240_v22, %v572_v10 }
 0x12d   : > { %v612_v12 = vmax.f32 %v578_v9, 0.0 }
 0x12e   : > { %v611_v13 = vmax.f32 %v573_v11, 0.0 }
 0x12f   : > { %628 = vst.msk [vmem:[#allocation2 + $0x70] sm:$0xff] %vm380_vm0, %v612_v12 }
 0x130   : > { %627 = vst.msk [vmem:[#allocation2 + $0x68] sm:$0xff] %vm380_vm0, %v611_v13 }
 0x131 PF: > { %2791 = vmatprep.subr.bf16.mxu1 %v3195_v4  ;;  %s731_s21 = sadd.s32 8, %s2548_s25  ;;  %p2575_p9 = scmp.ne.s32.totalorder %s2971_s12, 1 }
 0x132   : > { %2793 = vmatpush3.bf16.msra.mxu1 %v3195_v4  ;;  %p732_p8 = scmp.lt.s32.totalorder %s731_s21, 15  ;;  %v2994_v4 = vmov (!%p2575_p9), 0.0  }
 0x134   : > { %s4052_s21 = smov (!%p732_p8, %s731_s21), 15 }
 0x135   : > { %s2572_s23 = sshll.u32 %s4052_s21, 4 }
 0x136   : > { %s735_s26 = scalar_lea.vmem %s3165_s17, %s2572_s23 [#allocation4] }
 0x137   : > { %v736_v15 = vld [vmem:[%s735_s26] sm:$0xff]  ;;  %v737_v16 = vld [vmem:[%s735_s26 + $0x8] sm:$0xff] }
 0x138   : > { %2719 = vmatprep.mubr.msk.f32.mxu1 %vm407_vm1, %v736_v15 }
 0x139   : > { %2720 = vmatmul.mubr.msk.f32.vlgmr.msra.gmra.mrb[6].mxu1 %vm407_vm1, %v737_v16 }
 0x20c   : > { %v2721_v17 = vpop.f32.mrb[6].mxu1  ;;  %826 = sbr.rel (%p2575_p9) target bundleno = 532 (0x214), region = 68 }
 0x20d   : > { %v816_v18 = vadd.f32 %v2721_v17, %v3240_v22  ;;  %v810_v19 = vpop.f32.mrb[7].mxu1 }
 0x20e   : > { %v811_v20 = vadd.f32 %v3240_v22, %v810_v19 }
 0x20f   : > { %v820_v21 = vmax.f32 %v816_v18, 0.0 }
 0x210   : > { %v819_v23 = vmax.f32 %v811_v20, 0.0 }
 0x211   : > { %822 = vst.msk [vmem:[#allocation2 + $0xa0] sm:$0xff] %vm380_vm0, %v820_v21 }
 0x212   : > { %821 = vst.msk [vmem:[#allocation2 + $0x98] sm:$0xff] %vm380_vm0, %v819_v23  ;;  %828 = vst.msk [vmem:[#allocation2 + $0xa0] sm:$0xff] (!%p2575_p9), %vm380_vm0, %v2994_v4 }
 0x213   : > { %827 = vst.msk [vmem:[#allocation2 + $0x98] sm:$0xff] %vm380_vm0, %v2994_v4 }
 0x214 PF: > { %v846_v24 = vld [vmem:[%s4020_s8 + $0x8] sm:$0xff]  ;;  %v845_v22 = vld [vmem:[%s4020_s8] sm:$0xff]  ;;  %v2995_v25 = vmov 0   ;;  %v831_v28 = vld [vmem:[%s4019_s7 + $0x10] sm:$0xff]  ;;  %s2996_s18 = smov 4   ;;  %s2997_s22 = smov 16  }
 0x215   : > { %2890 = vset.pattern.permute.xlu1 %v2995_v25  ;;  %2889 = vset.pattern.permute.xlu0 %v2995_v25  ;;  %v830_v26 = vld [vmem:[%s4019_s7 + $0x8] sm:$0xff]  ;;  %v829_v27 = vld [vmem:[%s4019_s7] sm:$0xff]  ;;  %v847_v29 = vld [vmem:[%s4020_s8 + $0x10] sm:$0xff]  ;;  %s2998_s20 = smov 28   ;;  %s2999_s21 = smov 8   ;;  %vm2002_vm2 = vcmask 1043456  }
 0x216   : > { %1109 = vperm.xlu1 %2890, %v846_v24   ;;  %1104 = vperm.xlu0 %2889, %v845_v22   ;;  %v832_v30 = vld [vmem:[%s4019_s7 + $0x18] sm:$0xff]  ;;  %v833_v32 = vld [vmem:[%s4019_s7 + $0x20] sm:$0xff]  ;;  %v834_v34 = vld [vmem:[%s4019_s7 + $0x28] sm:$0xff]  ;;  %s3000_s23 = smov 12   ;;  %s3001_s26 = smov 20   ;;  %vm1069_vm3 = vcmask 64544  }
 0x217   : > { %v848_v31 = vld [vmem:[%s4020_s8 + $0x18] sm:$0xff]  ;;  %v849_v33 = vld [vmem:[%s4020_s8 + $0x20] sm:$0xff]  ;;  %v850_v35 = vld [vmem:[%s4020_s8 + $0x28] sm:$0xff]  ;;  %s3002_s17 = smov 24   ;;  %s3003_s24 = smov 32   ;;  %vm1262_vm4 = vcmask 97344  }
 0x218   : > { %v835_v36 = vld [vmem:[%s4019_s7 + $0x30] sm:$0xff]  ;;  %v836_v38 = vld [vmem:[%s4019_s7 + $0x38] sm:$0xff]  ;;  %v837_v40 = vld [vmem:[%s4019_s7 + $0x40] sm:$0xff]  ;;  %vm1375_vm5 = vcmask 130144   ;;  %vm1472_vm6 = vcmask 162944   ;;  %vm1585_vm7 = vcmask 195744  }
 0x219   : > { %v851_v37 = vld [vmem:[%s4020_s8 + $0x30] sm:$0xff]  ;;  %v852_v39 = vld [vmem:[%s4020_s8 + $0x38] sm:$0xff]  ;;  %v853_v41 = vld [vmem:[%s4020_s8 + $0x40] sm:$0xff]  ;;  %vm1698_vm8 = vcmask 228544   ;;  %vm1795_vm9 = vcmask 261344   ;;  %vm1908_vm10 = vcmask 294144  }
 0x21a   : > { %884 = vperm.xlu1 %2890, %v830_v26   ;;  %879 = vperm.xlu0 %2889, %v829_v27   ;;  %v838_v42 = vld [vmem:[%s4019_s7 + $0x48] sm:$0xff]  ;;  %v839_v44 = vld [vmem:[%s4019_s7 + $0x50] sm:$0xff]  ;;  %v840_v46 = vld [vmem:[%s4019_s7 + $0x58] sm:$0xff]  ;;  %vm1953_vm11 = vcmask 293888  }
 0x21b   : > { %v854_v43 = vld [vmem:[%s4020_s8 + $0x48] sm:$0xff]  ;;  %v855_v45 = vld [vmem:[%s4020_s8 + $0x50] sm:$0xff]  ;;  %v856_v47 = vld [vmem:[%s4020_s8 + $0x58] sm:$0xff] }
 0x21c   : > { %v841_v48 = vld [vmem:[%s4019_s7 + $0x60] sm:$0xff]  ;;  %v842_v50 = vld [vmem:[%s4019_s7 + $0x68] sm:$0xff]  ;;  %v843_v52 = vld [vmem:[%s4019_s7 + $0x70] sm:$0xff] }
 0x21d   : > { %v857_v49 = vld [vmem:[%s4020_s8 + $0x60] sm:$0xff]  ;;  %v858_v51 = vld [vmem:[%s4020_s8 + $0x68] sm:$0xff]  ;;  %v859_v53 = vld [vmem:[%s4020_s8 + $0x70] sm:$0xff] }
 0x21e   : > { %889 = vperm.xlu1 %2890, %v831_v28   ;;  %1114 = vperm.xlu0 %2889, %v847_v29   ;;  %v844_v54 = vld [vmem:[%s4019_s7 + $0x78] sm:$0xff]  ;;  %v990_v56 = vld [vmem:[#allocation2 + $0x10] sm:$0xff]  ;;  %v989_v57 = vld [vmem:[#allocation2 + $0x8] sm:$0xff] }
 0x21f   : > { %v860_v55 = vld [vmem:[%s4020_s8 + $0x78] sm:$0xff]  ;;  %v1715_v59 = vld [vmem:[#allocation2 + $0x28] sm:$0xff]  ;;  %v1393_v60 = vld [vmem:[#allocation2 + $0x20] sm:$0xff] }
 0x220   : > { %v991_v58 = vld [vmem:[#allocation2 + $0x18] sm:$0xff]  ;;  %v1395_v61 = vld [vmem:[#allocation2 + $0x30] sm:$0xff]  ;;  %v861_v9 = vld [vmem:[#allocation2 + $0x7] sm:$0xff] }
 0x221   : > { %v3401_v62 = vld [vmem:[#allocation2 + $0x38] sm:$0xff]  ;;  %v1086_v0 = vld [vmem:[#allocation2 + $0x9] sm:$0xff]  ;;  %v1490_v15 = vld [vmem:[#allocation2 + $0x21] sm:$0xff] }
 0x222   : > { %894 = vperm.xlu1 %2890, %v832_v30   ;;  %1119 = vperm.xlu0 %2889, %v848_v31   ;;  %v1087_v63 = vld [vmem:[#allocation2 + $0x11] sm:$0xff]  ;;  %v1280_v6 = vld [vmem:[#allocation2 + $0x1f] sm:$0xff]  ;;  %v1602_v26 = vld [vmem:[#allocation2 + $0x27] sm:$0xff] }
 0x223   : > { %v1279_v7 = vld [vmem:[#allocation2 + $0x17] sm:$0xff]  ;;  %v862_v8 = vld [vmem:[#allocation2 + $0xf] sm:$0xff]  ;;  %v1941_v29 = vld [vmem:[%s4015_s3] sm:$0xff] }
 0x224   : > { %v1489_v14 = vld [vmem:[#allocation2 + $0x19] sm:$0xff]  ;;  %v1603_v27 = vld [vmem:[#allocation2 + $0x2f] sm:$0xff] }
 0x225   : > { %v1942_v30 = vld [vmem:[%s4015_s3 + $0x8] sm:$0xff] }
 0x226   : > { %899 = vperm.xlu1 %2890, %v833_v32   ;;  %1124 = vperm.xlu0 %2889, %v849_v33   ;;  %v2794_v31 = vpack.c.bf16 %v1942_v30, %v1941_v29 }
 0x228   : > { %2795 = vmatprep.subr.bf16.mxu1 %v2794_v31 }
 0x229   : > { %2797 = vmatpush3.bf16.msra.mxu1 %v2794_v31 }
 0x22a   : > { %904 = vperm.xlu1 %2890, %v834_v34   ;;  %1129 = vperm.xlu0 %2889, %v850_v35  }
 0x22e   : > { %909 = vperm.xlu1 %2890, %v835_v36   ;;  %1134 = vperm.xlu0 %2889, %v851_v37   ;;  %v1943_v37 = vld [vmem:[%s4015_s3 + $0x10] sm:$0xff] }
 0x232   : > { %914 = vperm.xlu1 %2890, %v836_v38   ;;  %1139 = vperm.xlu0 %2889, %v852_v39   ;;  %v1944_v38 = vld [vmem:[%s4015_s3 + $0x18] sm:$0xff] }
 0x233   : > { %v2798_v39 = vpack.c.bf16 %v1944_v38, %v1943_v37 }
 0x235   : > { %2799 = vmatprep.subr.bf16.mxu1 %v2798_v39 }
 0x236   : > { %919 = vperm.xlu1 %2890, %v837_v40   ;;  %1144 = vperm.xlu0 %2889, %v853_v41  }
 0x237   : > { %2801 = vmatpush3.bf16.msra.mxu1 %v2798_v39 }
 0x23a   : > { %924 = vperm.xlu1 %2890, %v838_v42   ;;  %1149 = vperm.xlu0 %2889, %v854_v43  }
 0x23e   : > { %929 = vperm.xlu1 %2890, %v839_v44   ;;  %1154 = vperm.xlu0 %2889, %v855_v45   ;;  %v1812_v44 = vld [vmem:[#allocation2 + $0x29] sm:$0xff] }
 0x242   : > { %934 = vperm.xlu1 %2890, %v840_v46   ;;  %1159 = vperm.xlu0 %2889, %v856_v47   ;;  %v1945_v46 = vld [vmem:[%s4015_s3 + $0x20] sm:$0xf] }
 0x243   : > { %2730 = vmatprep.subr.msk.mxu1 %vm2002_vm2, %v1945_v46 }
 0x244   : > { %2731 = vmatpush3.msk.msra.mxu1 %vm2002_vm2, %v1945_v46 }
 0x246   : > { %939 = vperm.xlu1 %2890, %v841_v48   ;;  %1164 = vperm.xlu0 %2889, %v857_v49  }
 0x24a   : > { %944 = vperm.xlu1 %2890, %v842_v50   ;;  %1169 = vperm.xlu0 %2889, %v858_v51   ;;  %v1604_v51 = vld [vmem:[#allocation2 + $0x37] sm:$0xff] }
 0x24e   : > { %949 = vperm.xlu1 %2890, %v843_v52   ;;  %1174 = vperm.xlu0 %2889, %v859_v53   ;;  %v1813_v52 = vld [vmem:[#allocation2 + $0x31] sm:$0xff] }
 0x252   : > { %954 = vperm.xlu1 %2890, %v844_v54   ;;  %1179 = vperm.xlu0 %2889, %v860_v55  }
 0x256   : > { %1023 = vrot.lane.b32.xlu1 %v990_v56, %s2996_s18  ;;  %1021 = vrot.lane.b32.xlu0 %v989_v57, %s2996_s18 }
 0x25a   : > { %1025 = vrot.lane.b32.xlu1 %v991_v58, %s2996_s18  ;;  %1424 = vrot.lane.b32.xlu0 %v991_v58, %s2997_s22  ;;  %v1605_v58 = vld [vmem:[#allocation2 + $0x3f] sm:$0xff] }
 0x25e   : > { %1747 = vrot.lane.b32.xlu1 %v1715_v59, %s2998_s20  ;;  %1426 = vrot.lane.b32.xlu0 %v1393_v60, %s2997_s22 }
 0x262   : > { %1428 = vrot.lane.b32.xlu1 %v1715_v59, %s2997_s22  ;;  %1027 = vrot.lane.b32.xlu0 %v1393_v60, %s2996_s18 }
 0x266   : > { %1430 = vrot.lane.b32.xlu1 %v1395_v61, %s2997_s22  ;;  %1749 = vrot.lane.b32.xlu0 %v1395_v61, %s2998_s20 }
 0x26a   : > { %1751 = vrot.lane.b32.xlu1 %v3401_v62, %s2998_s20  ;;  %1029 = vrot.lane.b32.xlu0 %v1715_v59, %s2996_s18 }
 0x26e   : > { %1432 = vrot.lane.b32.xlu1 %v3401_v62, %s2997_s22  ;;  %1031 = vrot.lane.b32.xlu0 %v1395_v61, %s2996_s18 }
 0x295   : > { %v3409_v1 = vpop.permute.xlu1 %1109  ;;  %v3411_v2 = vpop.permute.xlu0 %1104 }
 0x296   : > { %v1183_v3 = vmul.f32 %v3409_v1, %v1087_v63  ;;  %v1182_v5 = vmul.f32 %v3411_v2, %v1086_v0  ;;  %v1505_v20 = vmul.f32 %v1489_v14, %v3411_v2  ;;  %v1506_v21 = vmul.f32 %v1490_v15, %v3409_v1 }
 0x297   : > { %v1828_v49 = vmul.f32 %v1812_v44, %v3411_v2  ;;  %v1829_v56 = vmul.f32 %v1813_v52, %v3409_v1  ;;  %v3502_v1 = vld [vmem:[#allocation2 + $0x47] sm:$0xff] }
 0x298   : > { %1216 = vrot.lane.b32.xlu1 %v1183_v3, %s2999_s21  ;;  %1214 = vrot.lane.b32.xlu0 %v1182_v5, %s2999_s21 }
 0x299   : > { %v885_v10 = vpop.permute.xlu1 %884  ;;  %v880_v11 = vpop.permute.xlu0 %879 }
 0x29a   : > { %v1296_v12 = vmul.f32 %v1280_v6, %v885_v10  ;;  %v1295_v13 = vmul.f32 %v1279_v7, %v880_v11  ;;  %v958_v16 = vmul.f32 %v885_v10, %v862_v8  ;;  %v957_v17 = vmul.f32 %v880_v11, %v861_v9  ;;  %v3515_v8 = vld [vmem:[#allocation2 + $0x4f] sm:$0xff] }
 0x29b   : > { %v1618_v34 = vmul.f32 %v1602_v26, %v880_v11  ;;  %v1619_v35 = vmul.f32 %v1603_v27, %v885_v10 }
 0x29c   : > { %1329 = vrot.lane.b32.xlu1 %v1296_v12, %s3000_s23  ;;  %1327 = vrot.lane.b32.xlu0 %v1295_v13, %s3000_s23  ;;  %974 = vst.msk [vmem:[#allocation3 + $0x8] sm:$0xff] %vm380_vm0, %v958_v16  ;;  %973 = vst.msk [vmem:[#allocation3] sm:$0xff] %vm380_vm0, %v957_v17 }
 0x29d   : > { %v3419_v18 = vpop.permute.xlu1 %889  ;;  %v3421_v19 = vpop.permute.xlu0 %1114 }
 0x29e   : > { %v959_v23 = vmul.f32 %v1279_v7, %v3419_v18  ;;  %v1184_v22 = vmul.f32 %v1489_v14, %v3421_v19  ;;  %v1297_v42 = vmul.f32 %v1602_v26, %v3419_v18  ;;  %v1507_v50 = vmul.f32 %v1812_v44, %v3421_v19  ;;  %v3528_v14 = vld [vmem:[#allocation2 + $0x57] sm:$0xff] }
 0x2a0   : > { %1537 = vrot.lane.b32.xlu1 %v1505_v20, %s3001_s26  ;;  %1539 = vrot.lane.b32.xlu0 %v1506_v21, %s3001_s26  ;;  %975 = vst.msk [vmem:[#allocation3 + $0x10] sm:$0xff] %vm380_vm0, %v959_v23  ;;  %v1718_v20 = vld [vmem:[#allocation2 + $0x40] sm:$0xff] }
 0x2a1   : > { %v3430_v4 = vpop.permute.xlu1 %894  ;;  %v3432_v24 = vpop.permute.xlu0 %1119  ;;  %v3539_v21 = vld [vmem:[#allocation2 + $0x5f] sm:$0xff] }
 0x2a2   : > { %v1185_v25 = vmul.f32 %v1490_v15, %v3432_v24  ;;  %v960_v28 = vmul.f32 %v1280_v6, %v3430_v4  ;;  %v1298_v43 = vmul.f32 %v1603_v27, %v3430_v4  ;;  %v1508_v57 = vmul.f32 %v1813_v52, %v3432_v24  ;;  %v1814_v15 = vld [vmem:[#allocation2 + $0x39] sm:$0xff] }
 0x2a3   : > { %v1620_v6 = vmul.f32 %v1604_v51, %v3419_v18  ;;  %v1621_v7 = vmul.f32 %v1605_v58, %v3430_v4  ;;  %v1830_v23 = vmul.f32 %v1814_v15, %v3421_v19  ;;  %v874_v19 = vld [vmem:[#allocation2 + $0x6f] sm:$0xff] }
 0x2a4   : > { %1218 = vrot.lane.b32.xlu1 %v1184_v22, %s2999_s21  ;;  %1220 = vrot.lane.b32.xlu0 %v1185_v25, %s2999_s21  ;;  %976 = vst.msk [vmem:[#allocation3 + $0x18] sm:$0xff] %vm380_vm0, %v960_v28  ;;  %v873_v22 = vld [vmem:[#allocation2 + $0x67] sm:$0xff] }
 0x2a5   : > { %v3446_v32 = vpop.permute.xlu1 %899  ;;  %v3448_v33 = vpop.permute.xlu0 %1124 }
 0x2a6   : > { %v961_v36 = vmul.f32 %v1602_v26, %v3446_v32  ;;  %v1186_v63 = vmul.f32 %v1812_v44, %v3448_v33  ;;  %v1299_v12 = vmul.f32 %v1604_v51, %v3446_v32 }
 0x2a8   : > { %1650 = vrot.lane.b32.xlu1 %v1618_v34, %s3002_s17  ;;  %1652 = vrot.lane.b32.xlu0 %v1619_v35, %s3002_s17  ;;  %977 = vst.msk [vmem:[#allocation3 + $0x20] sm:$0xff] %vm380_vm0, %v961_v36  ;;  %v1509_v34 = vmul.f32 %v1814_v15, %v3448_v33  ;;  %v875_v36 = vld [vmem:[#allocation2 + $0x77] sm:$0xff] }
 0x2a9   : > { %v3460_v40 = vpop.permute.xlu1 %904  ;;  %v3462_v41 = vpop.permute.xlu0 %1129 }
 0x2aa   : > { %v962_v45 = vmul.f32 %v1603_v27, %v3460_v40  ;;  %v1187_v0 = vmul.f32 %v1813_v52, %v3462_v41  ;;  %v1300_v13 = vmul.f32 %v1605_v58, %v3460_v40  ;;  %v1815_v27 = vld [vmem:[#allocation2 + $0x41] sm:$0xff] }
 0x2ab   : > { %v1831_v31 = vmul.f32 %v1815_v27, %v3432_v24  ;;  %v876_v24 = vld [vmem:[#allocation2 + $0x7f] sm:$0xff]  ;;  %v1510_v44 = vmul.f32 %v1815_v27, %v3462_v41 }
 0x2ac   : > { %1331 = vrot.lane.b32.xlu1 %v1297_v42, %s3000_s23  ;;  %1333 = vrot.lane.b32.xlu0 %v1298_v43, %s3000_s23  ;;  %978 = vst.msk [vmem:[#allocation3 + $0x28] sm:$0xff] %vm380_vm0, %v962_v45  ;;  %v1622_v45 = vmul.f32 %v3502_v1, %v3446_v32  ;;  %v1719_v32 = vld [vmem:[#allocation2 + $0x48] sm:$0xff] }
 0x2ad   : > { %v3473_v47 = vpop.permute.xlu1 %909  ;;  %v3475_v48 = vpop.permute.xlu0 %1134 }
 0x2ae   : > { %v963_v53 = vmul.f32 %v1604_v51, %v3473_v47  ;;  %v1188_v38 = vmul.f32 %v1814_v15, %v3475_v48  ;;  %v1301_v51 = vmul.f32 %v3502_v1, %v3473_v47  ;;  %v1624_v15 = vmul.f32 %v3528_v14, %v3473_v47 }
 0x2b0   : > { %1860 = vrot.lane.b32.xlu1 %v1828_v49, %s3003_s24  ;;  %1541 = vrot.lane.b32.xlu0 %v1507_v50, %s3001_s26  ;;  %979 = vst.msk [vmem:[#allocation3 + $0x30] sm:$0xff] %vm380_vm0, %v963_v53 }
 0x2b1   : > { %v3485_v54 = vpop.permute.xlu1 %914  ;;  %v3487_v55 = vpop.permute.xlu0 %1139 }
 0x2b2   : > { %v964_v59 = vmul.f32 %v1605_v58, %v3485_v54  ;;  %v1189_v52 = vmul.f32 %v1815_v27, %v3487_v55  ;;  %v1625_v47 = vmul.f32 %v3539_v21, %v3485_v54 }
 0x2b4   : > { %1862 = vrot.lane.b32.xlu1 %v1829_v56, %s3003_s24  ;;  %1543 = vrot.lane.b32.xlu0 %v1508_v57, %s3001_s26  ;;  %980 = vst.msk [vmem:[#allocation3 + $0x38] sm:$0xff] %vm380_vm0, %v964_v59  ;;  %v1623_v57 = vmul.f32 %v3515_v8, %v3460_v40  ;;  %v1302_v59 = vmul.f32 %v3515_v8, %v3485_v54 }
 0x2b5   : > { %v3495_v60 = vpop.permute.xlu1 %919  ;;  %v3497_v61 = vpop.permute.xlu0 %1144 }
 0x2b6   : > { %v965_v2 = vmul.f32 %v3502_v1, %v3495_v60 }
 0x2b8   : > { %1222 = vrot.lane.b32.xlu1 %v1186_v63, %s2999_s21  ;;  %1224 = vrot.lane.b32.xlu0 %v1187_v0, %s2999_s21  ;;  %981 = vst.msk [vmem:[#allocation3 + $0x40] sm:$0xff] %vm380_vm0, %v965_v2  ;;  %v1816_v63 = vld [vmem:[#allocation2 + $0x49] sm:$0xff] }
 0x2b9   : > { %v3508_v3 = vpop.permute.xlu1 %924  ;;  %v3510_v5 = vpop.permute.xlu0 %1149  ;;  %v1720_v0 = vld [vmem:[#allocation2 + $0x50] sm:$0xff]  ;;  %v1832_v40 = vmul.f32 %v1816_v63, %v3448_v33 }
 0x2ba   : > { %v966_v9 = vmul.f32 %v3515_v8, %v3508_v3  ;;  %v1304_v27 = vmul.f32 %v3539_v21, %v3508_v3 }
 0x2bc   : > { %1654 = vrot.lane.b32.xlu1 %v1620_v6, %s3002_s17  ;;  %1656 = vrot.lane.b32.xlu0 %v1621_v7, %s3002_s17  ;;  %982 = vst.msk [vmem:[#allocation3 + $0x48] sm:$0xff] %vm380_vm0, %v966_v9  ;;  %v1817_v6 = vld [vmem:[#allocation2 + $0x51] sm:$0xff]  ;;  %v1511_v9 = vmul.f32 %v1816_v63, %v3475_v48 }
 0x2bd   : > { %v3521_v10 = vpop.permute.xlu1 %929  ;;  %v3523_v11 = vpop.permute.xlu0 %1154  ;;  %v1833_v8 = vmul.f32 %v1817_v6, %v3462_v41  ;;  %v1512_v41 = vmul.f32 %v1817_v6, %v3487_v55 }
 0x2be   : > { %v967_v16 = vmul.f32 %v3528_v14, %v3521_v10 }
 0x2c0   : > { %1335 = vrot.lane.b32.xlu1 %v1299_v12, %s3000_s23  ;;  %1337 = vrot.lane.b32.xlu0 %v1300_v13, %s3000_s23  ;;  %983 = vst.msk [vmem:[#allocation3 + $0x50] sm:$0xff] %vm380_vm0, %v967_v16  ;;  %v1190_v13 = vmul.f32 %v1816_v63, %v3497_v61 }
 0x2c1   : > { %v3534_v17 = vpop.permute.xlu1 %934  ;;  %v3536_v18 = vpop.permute.xlu0 %1159 }
 0x2c2   : > { %v968_v4 = vmul.f32 %v3539_v21, %v3534_v17 }
 0x2c4   : > { %1864 = vrot.lane.b32.xlu1 %v1830_v23, %s3003_s24  ;;  %1753 = vrot.lane.b32.xlu0 %v1718_v20, %s2998_s20  ;;  %984 = vst.msk [vmem:[#allocation3 + $0x58] sm:$0xff] %vm380_vm0, %v968_v4  ;;  %v1191_v23 = vmul.f32 %v1817_v6, %v3510_v5 }
 0x2c5   : > { %v3546_v25 = vpop.permute.xlu1 %939  ;;  %v3548_v26 = vpop.permute.xlu0 %1164 }
 0x2c6   : > { %v969_v28 = vmul.f32 %v3546_v25, %v873_v22  ;;  %v1721_v22 = vld [vmem:[#allocation2 + $0x58] sm:$0xff] }
 0x2c8   : > { %1434 = vrot.lane.b32.xlu1 %v1718_v20, %s2997_s22  ;;  %1033 = vrot.lane.b32.xlu0 %v3401_v62, %s2996_s18  ;;  %985 = vst.msk [vmem:[#allocation3 + $0x60] sm:$0xff] %vm380_vm0, %v969_v28  ;;  %v1818_v28 = vld [vmem:[#allocation2 + $0x59] sm:$0xff] }
 0x2c9   : > { %v3555_v29 = vpop.permute.xlu1 %944  ;;  %v3557_v30 = vpop.permute.xlu0 %1169 }
 0x2ca   : > { %v970_v35 = vmul.f32 %v3555_v29, %v874_v19  ;;  %v1722_v19 = vld [vmem:[#allocation2 + $0x60] sm:$0xff] }
 0x2cc   : > { %1866 = vrot.lane.b32.xlu1 %v1831_v31, %s3003_s24  ;;  %1545 = vrot.lane.b32.xlu0 %v1509_v34, %s3001_s26  ;;  %986 = vst.msk [vmem:[#allocation3 + $0x68] sm:$0xff] %vm380_vm0, %v970_v35  ;;  %v1834_v31 = vmul.f32 %v1818_v28, %v3475_v48  ;;  %v1819_v34 = vld [vmem:[#allocation2 + $0x61] sm:$0xff]  ;;  %v1513_v35 = vmul.f32 %v1818_v28, %v3497_v61 }
 0x2cd   : > { %v3565_v37 = vpop.permute.xlu1 %949  ;;  %v3567_v62 = vpop.permute.xlu0 %1174  ;;  %v1835_v21 = vmul.f32 %v1819_v34, %v3487_v55  ;;  %v1192_v48 = vmul.f32 %v1818_v28, %v3523_v11 }
 0x2ce   : > { %v971_v39 = vmul.f32 %v3565_v37, %v875_v36 }
 0x2d0   : > { %1035 = vrot.lane.b32.xlu0 %v1718_v20, %s2996_s18  ;;  %1226 = vrot.lane.b32.xlu1 %v1188_v38, %s2999_s21  ;;  %987 = vst.msk [vmem:[#allocation3 + $0x70] sm:$0xff] %vm380_vm0, %v971_v39  ;;  %v1303_v20 = vmul.f32 %v3528_v14, %v3495_v60 }
 0x2d1   : > { %v3574_v42 = vpop.permute.xlu1 %954  ;;  %v3576_v43 = vpop.permute.xlu0 %1179 }
 0x2d2   : > { %v972_v46 = vmul.f32 %v3574_v42, %v876_v24 }
 0x2d4   : > { %1547 = vrot.lane.b32.xlu0 %v1510_v44, %s3001_s26  ;;  %1658 = vrot.lane.b32.xlu1 %v1622_v45, %s3002_s17  ;;  %988 = vst.msk [vmem:[#allocation3 + $0x78] sm:$0xff] %vm380_vm0, %v972_v46  ;;  %v1610_v44 = vld [vmem:[#allocation2 + $0x67] sm:$0xff]  ;;  %v1514_v45 = vmul.f32 %v1819_v34, %v3510_v5 }
 0x2d5   : > { %v1024_v49 = vpop.permute.xlu1 %1023  ;;  %v1022_v50 = vpop.permute.xlu0 %1021  ;;  %v1626_v55 = vmul.f32 %v1610_v44, %v3495_v60  ;;  %v1723_v60 = vld [vmem:[#allocation2 + $0x68] sm:$0xff] }
 0x2d6   : > { %1071 = vst.msk [vmem:[#allocation3 + $0x8] sm:$0xff] %vm1069_vm3, %v1024_v49  ;;  %1070 = vst.msk [vmem:[#allocation3] sm:$0xff] %vm1069_vm3, %v1022_v50  ;;  %v1305_v50 = vmul.f32 %v1610_v44, %v3521_v10 }
 0x2d8   : > { %1339 = vrot.lane.b32.xlu1 %v1301_v51, %s3000_s23  ;;  %1228 = vrot.lane.b32.xlu0 %v1189_v52, %s2999_s21  ;;  %v1193_v51 = vmul.f32 %v1819_v34, %v3536_v18 }
 0x2d9   : > { %v1026_v53 = vpop.permute.xlu1 %1025  ;;  %v3593_v56 = vpop.permute.xlu0 %1424 }
 0x2da   : > { %1072 = vst.msk [vmem:[#allocation3 + $0x10] sm:$0xff] %vm1069_vm3, %v1026_v53  ;;  %v1611_v53 = vld [vmem:[#allocation2 + $0x6f] sm:$0xff] }
 0x2dc   : > { %1755 = vrot.lane.b32.xlu1 %v1719_v32, %s2998_s20  ;;  %1660 = vrot.lane.b32.xlu0 %v1623_v57, %s3002_s17 }
 0x2dd   : > { %v3600_v58 = vpop.permute.xlu0 %1426  ;;  %v3619_v33 = vpop.permute.xlu1 %1747 }
 0x2e0   : > { %1436 = vrot.lane.b32.xlu1 %v1719_v32, %s2997_s22  ;;  %1341 = vrot.lane.b32.xlu0 %v1302_v59, %s3000_s23  ;;  %v1306_v59 = vmul.f32 %v1611_v53, %v3534_v17 }
 0x2e1   : > { %v1028_v1 = vpop.permute.xlu0 %1027  ;;  %v3628_v16 = vpop.permute.xlu1 %1428 }
 0x2e2   : > { %1073 = vst.msk [vmem:[#allocation3 + $0x18] sm:$0xff] %vm1069_vm3, %v1028_v1  ;;  %v1724_v1 = vld [vmem:[#allocation2 + $0x70] sm:$0xff] }
 0x2e4   : > { %1868 = vrot.lane.b32.xlu1 %v1832_v40, %s3003_s24  ;;  %1757 = vrot.lane.b32.xlu0 %v1720_v0, %s2998_s20 }
 0x2e5   : > { %v3610_v2 = vpop.permute.xlu0 %1749  ;;  %v3637_v4 = vpop.permute.xlu1 %1430 }
 0x2e8   : > { %1438 = vrot.lane.b32.xlu1 %v1720_v0, %s2997_s22  ;;  %1037 = vrot.lane.b32.xlu0 %v1719_v32, %s2996_s18 }
 0x2e9   : > { %v1030_v7 = vpop.permute.xlu0 %1029  ;;  %v3645_v14 = vpop.permute.xlu1 %1751 }
 0x2ea   : > { %1074 = vst.msk [vmem:[#allocation3 + $0x20] sm:$0xff] %vm1069_vm3, %v1030_v7 }
 0x2ec   : > { %1870 = vrot.lane.b32.xlu1 %v1833_v8, %s3003_s24  ;;  %1549 = vrot.lane.b32.xlu0 %v1511_v9, %s3001_s26  ;;  %v1821_v9 = vld [vmem:[#allocation2 + $0x71] sm:$0xff] }
 0x2ed   : > { %v1032_v12 = vpop.permute.xlu0 %1031  ;;  %v3652_v54 = vpop.permute.xlu1 %1432  ;;  %v1195_v28 = vmul.f32 %v1821_v9, %v3557_v30 }
 0x2ee   : > { %1075 = vst.msk [vmem:[#allocation3 + $0x28] sm:$0xff] %vm1069_vm3, %v1032_v12 }
 0x2f0   : > { %1039 = vrot.lane.b32.xlu0 %v1720_v0, %s2996_s18  ;;  %1230 = vrot.lane.b32.xlu1 %v1190_v13, %s2999_s21  ;;  %v1820_v0 = vld [vmem:[#allocation2 + $0x69] sm:$0xff] }
 0x2f1   : > { %v1836_v40 = vmul.f32 %v1820_v0, %v3497_v61  ;;  %v1837_v61 = vmul.f32 %v1821_v9, %v3510_v5 }
 0x2f4   : > { %1551 = vrot.lane.b32.xlu0 %v1512_v41, %s3001_s26  ;;  %1662 = vrot.lane.b32.xlu1 %v1624_v15, %s3002_s17  ;;  %v1194_v15 = vmul.f32 %v1820_v0, %v3548_v26 }
 0x2f8   : > { %1343 = vrot.lane.b32.xlu1 %v1303_v20, %s3000_s23  ;;  %1232 = vrot.lane.b32.xlu0 %v1191_v23, %s2999_s21  ;;  %v1612_v23 = vld [vmem:[#allocation2 + $0x77] sm:$0xff] }
 0x2fc   : > { %1759 = vrot.lane.b32.xlu1 %v1721_v22, %s2998_s20  ;;  %1664 = vrot.lane.b32.xlu0 %v1625_v47, %s3002_s17 }
 0x300   : > { %1440 = vrot.lane.b32.xlu1 %v1721_v22, %s2997_s22  ;;  %1345 = vrot.lane.b32.xlu0 %v1304_v27, %s3000_s23 }
 0x304   : > { %1872 = vrot.lane.b32.xlu1 %v1834_v31, %s3003_s24  ;;  %1761 = vrot.lane.b32.xlu0 %v1722_v19, %s2998_s20  ;;  %v1613_v31 = vld [vmem:[#allocation2 + $0x7f] sm:$0xff] }
 0x305   : > { %v1629_v34 = vmul.f32 %v1613_v31, %v3534_v17  ;;  %v1726_v17 = vld [vmem:[#allocation2 + $0x80] sm:$0xff] }
 0x308   : > { %1442 = vrot.lane.b32.xlu1 %v1722_v19, %s2997_s22  ;;  %1041 = vrot.lane.b32.xlu0 %v1721_v22, %s2996_s18  ;;  %v1516_v22 = vmul.f32 %v1821_v9, %v3536_v18 }
 0x30a   : > { %v1217_v36 = vpop.permute.xlu1 %1216  ;;  %v1215_v38 = vpop.permute.xlu0 %1214 }
 0x30b   : > { %1264 = vst.msk [vmem:[#allocation3 + $0x8] sm:$0xff] %vm1262_vm4, %v1217_v36  ;;  %1263 = vst.msk [vmem:[#allocation3] sm:$0xff] %vm1262_vm4, %v1215_v38  ;;  %v1308_v36 = vmul.f32 %v1613_v31, %v3555_v29 }
 0x30c   : > { %1874 = vrot.lane.b32.xlu1 %v1835_v21, %s3003_s24  ;;  %1553 = vrot.lane.b32.xlu0 %v1513_v35, %s3001_s26 }
 0x30e   : > { %v1330_v39 = vpop.permute.xlu1 %1329  ;;  %v1328_v24 = vpop.permute.xlu0 %1327 }
 0x30f   : > { %1377 = vst.msk [vmem:[#allocation3 + $0x8] sm:$0xff] %vm1375_vm5, %v1330_v39  ;;  %1376 = vst.msk [vmem:[#allocation3] sm:$0xff] %vm1375_vm5, %v1328_v24  ;;  %v1822_v24 = vld [vmem:[#allocation2 + $0x79] sm:$0xff] }
 0x310   : > { %1043 = vrot.lane.b32.xlu0 %v1722_v19, %s2996_s18  ;;  %1234 = vrot.lane.b32.xlu1 %v1192_v48, %s2999_s21  ;;  %1473 = vst.msk [vmem:[#allocation3] sm:$0xff] %vm1472_vm6, %v3593_v56  ;;  %1474 = vst.msk [vmem:[#allocation3 + $0x8] sm:$0xff] %vm1472_vm6, %v3600_v58  ;;  %v1627_v56 = vmul.f32 %v1611_v53, %v3508_v3  ;;  %v1838_v44 = vmul.f32 %v1822_v24, %v3523_v11 }
 0x312   : > { %v1538_v46 = vpop.permute.xlu1 %1537  ;;  %v1540_v49 = vpop.permute.xlu0 %1539 }
 0x313   : > { %1586 = vst.msk [vmem:[#allocation3] sm:$0xff] %vm1585_vm7, %v1538_v46  ;;  %1587 = vst.msk [vmem:[#allocation3 + $0x8] sm:$0xff] %vm1585_vm7, %v1540_v49 }
 0x314   : > { %1555 = vrot.lane.b32.xlu0 %v1514_v45, %s3001_s26  ;;  %1666 = vrot.lane.b32.xlu1 %v1626_v55, %s3002_s17 }
 0x316   : > { %v1219_v52 = vpop.permute.xlu1 %1218  ;;  %v1221_v32 = vpop.permute.xlu0 %1220 }
 0x317   : > { %1265 = vst.msk [vmem:[#allocation3 + $0x10] sm:$0xff] %vm1262_vm4, %v1219_v52  ;;  %1266 = vst.msk [vmem:[#allocation3 + $0x18] sm:$0xff] %vm1262_vm4, %v1221_v32  ;;  %v1517_v52 = vmul.f32 %v1822_v24, %v3548_v26 }
 0x318   : > { %1347 = vrot.lane.b32.xlu1 %v1305_v50, %s3000_s23  ;;  %1236 = vrot.lane.b32.xlu0 %v1193_v51, %s2999_s21  ;;  %v1823_v51 = vld [vmem:[#allocation2 + $0x81] sm:$0xff] }
 0x31a   : > { %v1651_v57 = vpop.permute.xlu1 %1650  ;;  %v1653_v58 = vpop.permute.xlu0 %1652 }
 0x31b   : > { %1699 = vst.msk [vmem:[#allocation3] sm:$0xff] %vm1698_vm8, %v1651_v57  ;;  %1700 = vst.msk [vmem:[#allocation3 + $0x8] sm:$0xff] %vm1698_vm8, %v1653_v58  ;;  %v1614_v58 = vld [vmem:[#allocation2 + $0x87] sm:$0xff] }
 0x31c   : > { %1763 = vrot.lane.b32.xlu1 %v1723_v60, %s2998_s20  ;;  %1668 = vrot.lane.b32.xlu0 %v1627_v56, %s3002_s17  ;;  %1796 = vst.msk [vmem:[#allocation3] sm:$0xff] %vm1795_vm9, %v3619_v33  ;;  %1797 = vst.msk [vmem:[#allocation3 + $0x8] sm:$0xff] %vm1795_vm9, %v3610_v2  ;;  %v1515_v33 = vmul.f32 %v1820_v0, %v3523_v11  ;;  %v1839_v11 = vmul.f32 %v1823_v51, %v3536_v18 }
 0x31d   : > { %v1630_v18 = vmul.f32 %v1614_v58, %v3546_v25  ;;  %v1309_v0 = vmul.f32 %v1614_v58, %v3565_v37 }
 0x31e   : > { %v1332_v63 = vpop.permute.xlu1 %1331  ;;  %v1334_v3 = vpop.permute.xlu0 %1333 }
 0x31f   : > { %1378 = vst.msk [vmem:[#allocation3 + $0x10] sm:$0xff] %vm1375_vm5, %v1332_v63  ;;  %1379 = vst.msk [vmem:[#allocation3 + $0x18] sm:$0xff] %vm1375_vm5, %v1334_v3 }
 0x320   : > { %1475 = vst.msk [vmem:[#allocation3 + $0x10] sm:$0xff] %vm1472_vm6, %v3628_v16  ;;  %1476 = vst.msk [vmem:[#allocation3 + $0x18] sm:$0xff] %vm1472_vm6, %v3637_v4  ;;  %1444 = vrot.lane.b32.xlu1 %v1723_v60, %s2997_s22  ;;  %1349 = vrot.lane.b32.xlu0 %v1306_v59, %s3000_s23  ;;  %v1628_v4 = vmul.f32 %v1612_v23, %v3521_v10  ;;  %v1518_v59 = vmul.f32 %v1823_v51, %v3557_v30 }
 0x322   : > { %v1861_v2 = vpop.permute.xlu1 %1860  ;;  %v1542_v6 = vpop.permute.xlu0 %1541 }
 0x323   : > { %1909 = vst.msk [vmem:[#allocation3] sm:$0xff] %vm1908_vm10, %v1861_v2 }
 0x324   : > { %1588 = vst.msk [vmem:[#allocation3 + $0x10] sm:$0xff] %vm1585_vm7, %v1542_v6  ;;  %1876 = vrot.lane.b32.xlu1 %v1836_v40, %s3003_s24  ;;  %1765 = vrot.lane.b32.xlu0 %v1724_v1, %s2998_s20  ;;  %v1615_v6 = vld [vmem:[#allocation2 + $0x8f] sm:$0xff] }
 0x326   : > { %v1863_v7 = vpop.permute.xlu1 %1862  ;;  %v1544_v8 = vpop.permute.xlu0 %1543 }
 0x327   : > { %1910 = vst.msk [vmem:[#allocation3 + $0x8] sm:$0xff] %vm1908_vm10, %v1863_v7  ;;  %v1631_v7 = vmul.f32 %v1615_v6, %v3555_v29  ;;  %v1728_v29 = vld [vmem:[#allocation2 + $0x90] sm:$0xff] }
 0x328   : > { %1589 = vst.msk [vmem:[#allocation3 + $0x18] sm:$0xff] %vm1585_vm7, %v1544_v8  ;;  %1446 = vrot.lane.b32.xlu1 %v1724_v1, %s2997_s22  ;;  %1045 = vrot.lane.b32.xlu0 %v1723_v60, %s2996_s18  ;;  %v1196_v60 = vmul.f32 %v1822_v24, %v3567_v62 }
 0x32a   : > { %v1223_v12 = vpop.permute.xlu1 %1222  ;;  %v1225_v13 = vpop.permute.xlu0 %1224  ;;  %v1925_v41 = vld [vmem:[#allocation3] sm:$0xff] }
 0x32b   : > { %1267 = vst.msk [vmem:[#allocation3 + $0x20] sm:$0xff] %vm1262_vm4, %v1223_v12  ;;  %1268 = vst.msk [vmem:[#allocation3 + $0x28] sm:$0xff] %vm1262_vm4, %v1225_v13  ;;  %2732 = vmatprep.mubr.msk.f32.mxu1 %vm1953_vm11, %v1925_v41  ;;  %v1824_v41 = vld [vmem:[#allocation2 + $0x89] sm:$0xff] }
 0x32c   : > { %1878 = vrot.lane.b32.xlu1 %v1837_v61, %s3003_s24  ;;  %1557 = vrot.lane.b32.xlu0 %v1515_v33, %s3001_s26  ;;  %v1310_v61 = vmul.f32 %v1615_v6, %v3574_v42 }
 0x32e   : > { %v1655_v16 = vpop.permute.xlu1 %1654  ;;  %v1657_v20 = vpop.permute.xlu0 %1656  ;;  %v1926_v5 = vld [vmem:[#allocation3 + $0x8] sm:$0xff] }
 0x32f   : > { %1701 = vst.msk [vmem:[#allocation3 + $0x10] sm:$0xff] %vm1698_vm8, %v1655_v16  ;;  %1702 = vst.msk [vmem:[#allocation3 + $0x18] sm:$0xff] %vm1698_vm8, %v1657_v20  ;;  %2733 = vmatmul.mubr.msk.f32.vlgmr.msra.gmra.mrb[8].mxu1 %vm1953_vm11, %v1926_v5  ;;  %v1519_v5 = vmul.f32 %v1824_v41, %v3567_v62 }
 0x330   : > { %1798 = vst.msk [vmem:[#allocation3 + $0x10] sm:$0xff] %vm1795_vm9, %v3645_v14  ;;  %1238 = vrot.lane.b32.xlu1 %v1194_v15, %s2999_s21  ;;  %1047 = vrot.lane.b32.xlu0 %v1724_v1, %s2996_s18  ;;  %v1307_v14 = vmul.f32 %v1612_v23, %v3546_v25  ;;  %v1197_v1 = vmul.f32 %v1823_v51, %v3576_v43  ;;  %v1727_v25 = vld [vmem:[#allocation2 + $0x88] sm:$0xff] }
 0x331   : > { %v1840_v15 = vmul.f32 %v1824_v41, %v3548_v26 }
 0x332   : > { %v1336_v47 = vpop.permute.xlu1 %1335  ;;  %v1338_v27 = vpop.permute.xlu0 %1337 }
 0x333   : > { %1380 = vst.msk [vmem:[#allocation3 + $0x20] sm:$0xff] %vm1375_vm5, %v1336_v47  ;;  %1381 = vst.msk [vmem:[#allocation3 + $0x28] sm:$0xff] %vm1375_vm5, %v1338_v27  ;;  %v1825_v47 = vld [vmem:[#allocation2 + $0x91] sm:$0xff] }
 0x334   : > { %1477 = vst.msk [vmem:[#allocation3 + $0x20] sm:$0xff] %vm1472_vm6, %v3652_v54  ;;  %1670 = vrot.lane.b32.xlu1 %v1628_v4, %s3002_s17  ;;  %1559 = vrot.lane.b32.xlu0 %v1516_v22, %s3001_s26  ;;  %v1725_v54 = vld [vmem:[#allocation2 + $0x78] sm:$0xff]  ;;  %v1841_v26 = vmul.f32 %v1825_v47, %v3557_v30  ;;  %v1520_v27 = vmul.f32 %v1825_v47, %v3576_v43 }
 0x336   : > { %v1865_v10 = vpop.permute.xlu1 %1864  ;;  %v1754_v19 = vpop.permute.xlu0 %1753 }
 0x337   : > { %1911 = vst.msk [vmem:[#allocation3 + $0x10] sm:$0xff] %vm1908_vm10, %v1865_v10  ;;  %v1616_v10 = vld [vmem:[#allocation2 + $0x97] sm:$0xff] }
 0x338   : > { %1799 = vst.msk [vmem:[#allocation3 + $0x18] sm:$0xff] %vm1795_vm9, %v1754_v19  ;;  %1351 = vrot.lane.b32.xlu1 %v1307_v14, %s3000_s23  ;;  %1240 = vrot.lane.b32.xlu0 %v1195_v28, %s2999_s21  ;;  %v1617_v19 = vld [vmem:[#allocation2 + $0x9f] sm:$0xff]  ;;  %v1632_v31 = vmul.f32 %v1616_v10, %v3565_v37 }
 0x33a   : > { %v1435_v21 = vpop.permute.xlu1 %1434  ;;  %v1034_v35 = vpop.permute.xlu0 %1033 }
 0x33b   : > { %1478 = vst.msk [vmem:[#allocation3 + $0x28] sm:$0xff] %vm1472_vm6, %v1435_v21  ;;  %v1730_v21 = vld [vmem:[#allocation2 + $0xa0] sm:$0xff] }
 0x33c   : > { %1076 = vst.msk [vmem:[#allocation3 + $0x30] sm:$0xff] %vm1069_vm3, %v1034_v35  ;;  %1767 = vrot.lane.b32.xlu1 %v1725_v54, %s2998_s20  ;;  %1672 = vrot.lane.b32.xlu0 %v1629_v34, %s3002_s17  ;;  %v1729_v35 = vld [vmem:[#allocation2 + $0x98] sm:$0xff] }
 0x33e   : > { %v1867_v38 = vpop.permute.xlu1 %1866  ;;  %v1546_v48 = vpop.permute.xlu0 %1545  ;;  %v1927_v39 = vld [vmem:[#allocation3 + $0x10] sm:$0xff] }
 0x33f   : > { %1912 = vst.msk [vmem:[#allocation3 + $0x18] sm:$0xff] %vm1908_vm10, %v1867_v38  ;;  %2735 = vmatprep.mubr.msk.f32.mxu1 %vm1953_vm11, %v1927_v39  ;;  %v1827_v39 = vld [vmem:[#allocation2 + $0xa1] sm:$0xff] }
 0x340   : > { %1590 = vst.msk [vmem:[#allocation3 + $0x20] sm:$0xff] %vm1585_vm7, %v1546_v48  ;;  %1448 = vrot.lane.b32.xlu1 %v1725_v54, %s2997_s22  ;;  %1353 = vrot.lane.b32.xlu0 %v1308_v36, %s3000_s23  ;;  %v1826_v48 = vld [vmem:[#allocation2 + $0x99] sm:$0xff] }
 0x341   : > { %v1842_v37 = vmul.f32 %v1826_v48, %v3567_v62 }
 0x342   : > { %v1227_v55 = vpop.permute.xlu1 %1226  ;;  %v1036_v45 = vpop.permute.xlu0 %1035 }
 0x343   : > { %1269 = vst.msk [vmem:[#allocation3 + $0x30] sm:$0xff] %vm1262_vm4, %v1227_v55 }
 0x344   : > { %1077 = vst.msk [vmem:[#allocation3 + $0x38] sm:$0xff] %vm1069_vm3, %v1036_v45  ;;  %1880 = vrot.lane.b32.xlu1 %v1838_v44, %s3003_s24  ;;  %1769 = vrot.lane.b32.xlu0 %v1726_v17, %s2998_s20 }
 0x346   : > { %v1659_v46 = vpop.permute.xlu1 %1658  ;;  %v1548_v49 = vpop.permute.xlu0 %1547  ;;  %v1928_v50 = vld [vmem:[#allocation3 + $0x18] sm:$0xff] }
 0x347   : > { %1703 = vst.msk [vmem:[#allocation3 + $0x20] sm:$0xff] %vm1698_vm8, %v1659_v46  ;;  %2736 = vmatmul.mubr.msk.f32.gmra.mrb[10].mxu1 %vm1953_vm11, %v1928_v50  ;;  %v2167_v50 = vld [vmem:[%s4017_s5] sm:$0xf] }
 0x348   : > { %1591 = vst.msk [vmem:[#allocation3 + $0x28] sm:$0xff] %vm1585_vm7, %v1548_v49  ;;  %1450 = vrot.lane.b32.xlu1 %v1726_v17, %s2997_s22  ;;  %1049 = vrot.lane.b32.xlu0 %v1725_v54, %s2996_s18  ;;  %v1633_v54 = vmul.f32 %v1617_v19, %v3574_v42  ;;  %v1843_v42 = vmul.f32 %v1827_v39, %v3576_v43 }
 0x349   : > { %2756 = vmatprep.subr.msk.mxu0 %vm2002_vm2, %v2167_v50 }
 0x34a   : > { %v1340_v32 = vpop.permute.xlu1 %1339  ;;  %v1229_v53 = vpop.permute.xlu0 %1228  ;;  %2757 = vmatpush3.msk.msra.mxu0 %vm2002_vm2, %v2167_v50 }
 0x34b   : > { %1382 = vst.msk [vmem:[#allocation3 + $0x30] sm:$0xff] %vm1375_vm5, %v1340_v32 }
 0x34c   : > { %1270 = vst.msk [vmem:[#allocation3 + $0x38] sm:$0xff] %vm1262_vm4, %v1229_v53  ;;  %1882 = vrot.lane.b32.xlu1 %v1839_v11, %s3003_s24  ;;  %1561 = vrot.lane.b32.xlu0 %v1517_v52, %s3001_s26 }
 0x34e   : > { %v1756_v56 = vpop.permute.xlu1 %1755  ;;  %v1661_v57 = vpop.permute.xlu0 %1660 }
 0x34f   : > { %1800 = vst.msk [vmem:[#allocation3 + $0x20] sm:$0xff] %vm1795_vm9, %v1756_v56 }
 0x350   : > { %1704 = vst.msk [vmem:[#allocation3 + $0x28] sm:$0xff] %vm1698_vm8, %v1661_v57  ;;  %1242 = vrot.lane.b32.xlu1 %v1196_v60, %s2999_s21  ;;  %1051 = vrot.lane.b32.xlu0 %v1726_v17, %s2996_s18 }
 0x352   : > { %v1437_v63 = vpop.permute.xlu1 %1436  ;;  %v1342_v3 = vpop.permute.xlu0 %1341 }
 0x353   : > { %1479 = vst.msk [vmem:[#allocation3 + $0x30] sm:$0xff] %vm1472_vm6, %v1437_v63 }
 0x354   : > { %1383 = vst.msk [vmem:[#allocation3 + $0x38] sm:$0xff] %vm1375_vm5, %v1342_v3  ;;  %1674 = vrot.lane.b32.xlu1 %v1630_v18, %s3002_s17  ;;  %1563 = vrot.lane.b32.xlu0 %v1518_v59, %s3001_s26 }
 0x356   : > { %v1869_v40 = vpop.permute.xlu1 %1868  ;;  %v1758_v2 = vpop.permute.xlu0 %1757 }
 0x357   : > { %1913 = vst.msk [vmem:[#allocation3 + $0x20] sm:$0xff] %vm1908_vm10, %v1869_v40 }
 0x358   : > { %1801 = vst.msk [vmem:[#allocation3 + $0x28] sm:$0xff] %vm1795_vm9, %v1758_v2  ;;  %1355 = vrot.lane.b32.xlu1 %v1309_v0, %s3000_s23  ;;  %1244 = vrot.lane.b32.xlu0 %v1197_v1, %s2999_s21 }
 0x35a   : > { %v1439_v8 = vpop.permute.xlu1 %1438  ;;  %v1038_v9 = vpop.permute.xlu0 %1037 }
 0x35b   : > { %1480 = vst.msk [vmem:[#allocation3 + $0x38] sm:$0xff] %vm1472_vm6, %v1439_v8 }
 0x35c   : > { %1078 = vst.msk [vmem:[#allocation3 + $0x40] sm:$0xff] %vm1069_vm3, %v1038_v9  ;;  %1771 = vrot.lane.b32.xlu1 %v1727_v25, %s2998_s20  ;;  %1676 = vrot.lane.b32.xlu0 %v1631_v7, %s3002_s17 }
 0x35e   : > { %v1871_v33 = vpop.permute.xlu1 %1870  ;;  %v1550_v12 = vpop.permute.xlu0 %1549  ;;  %v1929_v13 = vld [vmem:[#allocation3 + $0x20] sm:$0xff] }
 0x35f   : > { %1914 = vst.msk [vmem:[#allocation3 + $0x28] sm:$0xff] %vm1908_vm10, %v1871_v33  ;;  %2738 = vmatprep.mubr.msk.f32.mxu1 %vm1953_vm11, %v1929_v13 }
 0x360   : > { %1592 = vst.msk [vmem:[#allocation3 + $0x30] sm:$0xff] %vm1585_vm7, %v1550_v12  ;;  %1452 = vrot.lane.b32.xlu1 %v1727_v25, %s2997_s22  ;;  %1357 = vrot.lane.b32.xlu0 %v1310_v61, %s3000_s23 }
 0x362   : > { %v1231_v16 = vpop.permute.xlu1 %1230  ;;  %v1040_v20 = vpop.permute.xlu0 %1039 }
 0x363   : > { %1271 = vst.msk [vmem:[#allocation3 + $0x40] sm:$0xff] %vm1262_vm4, %v1231_v16 }
 0x364   : > { %1079 = vst.msk [vmem:[#allocation3 + $0x48] sm:$0xff] %vm1069_vm3, %v1040_v20  ;;  %1884 = vrot.lane.b32.xlu1 %v1840_v15, %s3003_s24  ;;  %1773 = vrot.lane.b32.xlu0 %v1728_v29, %s2998_s20 }
 0x366   : > { %v1663_v23 = vpop.permute.xlu1 %1662  ;;  %v1552_v4 = vpop.permute.xlu0 %1551  ;;  %v1930_v22 = vld [vmem:[#allocation3 + $0x28] sm:$0xff] }
 0x367   : > { %1705 = vst.msk [vmem:[#allocation3 + $0x30] sm:$0xff] %vm1698_vm8, %v1663_v23  ;;  %2739 = vmatmul.mubr.msk.f32.gmra.mrb[12].mxu1 %vm1953_vm11, %v1930_v22 }
 0x368   : > { %1593 = vst.msk [vmem:[#allocation3 + $0x38] sm:$0xff] %vm1585_vm7, %v1552_v4  ;;  %1565 = vrot.lane.b32.xlu1 %v1519_v5, %s3001_s26  ;;  %1454 = vrot.lane.b32.xlu0 %v1728_v29, %s2997_s22 }
 0x36a   : > { %v1344_v14 = vpop.permute.xlu1 %1343  ;;  %v1233_v28 = vpop.permute.xlu0 %1232 }
 0x36b   : > { %1384 = vst.msk [vmem:[#allocation3 + $0x40] sm:$0xff] %vm1375_vm5, %v1344_v14 }
 0x36c   : > { %1272 = vst.msk [vmem:[#allocation3 + $0x48] sm:$0xff] %vm1262_vm4, %v1233_v28  ;;  %1567 = vrot.lane.b32.xlu1 %v1520_v27, %s3001_s26  ;;  %1886 = vrot.lane.b32.xlu0 %v1841_v26, %s3003_s24 }
 0x36e   : > { %v1760_v34 = vpop.permute.xlu1 %1759  ;;  %v1665_v30 = vpop.permute.xlu0 %1664 }
 0x36f   : > { %1802 = vst.msk [vmem:[#allocation3 + $0x30] sm:$0xff] %vm1795_vm9, %v1760_v34 }
 0x370   : > { %1706 = vst.msk [vmem:[#allocation3 + $0x38] sm:$0xff] %vm1698_vm8, %v1665_v30  ;;  %1680 = vrot.lane.b32.xlu1 %v1633_v54, %s3002_s17  ;;  %1678 = vrot.lane.b32.xlu0 %v1632_v31, %s3002_s17 }
 0x372   : > { %v1441_v36 = vpop.permute.xlu1 %1440  ;;  %v1346_v38 = vpop.permute.xlu0 %1345 }
 0x373   : > { %1481 = vst.msk [vmem:[#allocation3 + $0x40] sm:$0xff] %vm1472_vm6, %v1441_v36 }
 0x374   : > { %1385 = vst.msk [vmem:[#allocation3 + $0x48] sm:$0xff] %vm1375_vm5, %v1346_v38  ;;  %1777 = vrot.lane.b32.xlu1 %v1730_v21, %s2998_s20  ;;  %1775 = vrot.lane.b32.xlu0 %v1729_v35, %s2998_s20 }
 0x376   : > { %v1873_v24 = vpop.permute.xlu1 %1872  ;;  %v1762_v17 = vpop.permute.xlu0 %1761 }
 0x377   : > { %1915 = vst.msk [vmem:[#allocation3 + $0x30] sm:$0xff] %vm1908_vm10, %v1873_v24 }
 0x378   : > { %1803 = vst.msk [vmem:[#allocation3 + $0x38] sm:$0xff] %vm1795_vm9, %v1762_v17  ;;  %1890 = vrot.lane.b32.xlu1 %v1843_v42, %s3003_s24  ;;  %1888 = vrot.lane.b32.xlu0 %v1842_v37, %s3003_s24 }
 0x37a   : > { %v1443_v44 = vpop.permute.xlu1 %1442  ;;  %v1042_v55 = vpop.permute.xlu0 %1041 }
 0x37b   : > { %1482 = vst.msk [vmem:[#allocation3 + $0x48] sm:$0xff] %vm1472_vm6, %v1443_v44 }
 0x37c   : > { %1080 = vst.msk [vmem:[#allocation3 + $0x50] sm:$0xff] %vm1069_vm3, %v1042_v55 }
 0x37e   : > { %v1875_v45 = vpop.permute.xlu1 %1874  ;;  %v1554_v62 = vpop.permute.xlu0 %1553  ;;  %v1931_v46 = vld [vmem:[#allocation3 + $0x30] sm:$0xff] }
 0x37f   : > { %1916 = vst.msk [vmem:[#allocation3 + $0x38] sm:$0xff] %vm1908_vm10, %v1875_v45  ;;  %2741 = vmatprep.mubr.msk.f32.mxu1 %vm1953_vm11, %v1931_v46 }
 0x380   : > { %1594 = vst.msk [vmem:[#allocation3 + $0x40] sm:$0xff] %vm1585_vm7, %v1554_v62 }
 0x382   : > { %v1235_v43 = vpop.permute.xlu1 %1234  ;;  %v1044_v49 = vpop.permute.xlu0 %1043 }
 0x383   : > { %1273 = vst.msk [vmem:[#allocation3 + $0x50] sm:$0xff] %vm1262_vm4, %v1235_v43  ;;  %v2576_v43 = vld [vmem:[%s4016_s4] ss:$0 sm:$0xff] }
 0x384   : > { %1081 = vst.msk [vmem:[#allocation3 + $0x58] sm:$0xff] %vm1069_vm3, %v1044_v49 }
 0x386   : > { %v1667_v51 = vpop.permute.xlu1 %1666  ;;  %v1556_v11 = vpop.permute.xlu0 %1555  ;;  %v1932_v52 = vld [vmem:[#allocation3 + $0x38] sm:$0xff] }
 0x387   : > { %1707 = vst.msk [vmem:[#allocation3 + $0x40] sm:$0xff] %vm1698_vm8, %v1667_v51  ;;  %2742 = vmatmul.mubr.msk.f32.gmra.mrb[14].mxu1 %vm1953_vm11, %v1932_v52 }
 0x388   : > { %1595 = vst.msk [vmem:[#allocation3 + $0x48] sm:$0xff] %vm1585_vm7, %v1556_v11 }
 0x38a   : > { %v1348_v32 = vpop.permute.xlu1 %1347  ;;  %v1237_v53 = vpop.permute.xlu0 %1236 }
 0x38b   : > { %1386 = vst.msk [vmem:[#allocation3 + $0x50] sm:$0xff] %vm1375_vm5, %v1348_v32 }
 0x38c   : > { %1274 = vst.msk [vmem:[#allocation3 + $0x58] sm:$0xff] %vm1262_vm4, %v1237_v53 }
 0x38e   : > { %v1764_v60 = vpop.permute.xlu1 %1763  ;;  %v1669_v56 = vpop.permute.xlu0 %1668 }
 0x38f   : > { %1804 = vst.msk [vmem:[#allocation3 + $0x40] sm:$0xff] %vm1795_vm9, %v1764_v60 }
 0x390   : > { %1708 = vst.msk [vmem:[#allocation3 + $0x48] sm:$0xff] %vm1698_vm8, %v1669_v56 }
 0x392   : > { %v1445_v57 = vpop.permute.xlu1 %1444  ;;  %v1350_v58 = vpop.permute.xlu0 %1349 }
 0x393   : > { %1483 = vst.msk [vmem:[#allocation3 + $0x50] sm:$0xff] %vm1472_vm6, %v1445_v57 }
 0x394   : > { %1387 = vst.msk [vmem:[#allocation3 + $0x58] sm:$0xff] %vm1375_vm5, %v1350_v58 }
 0x396   : > { %v1877_v18 = vpop.permute.xlu1 %1876  ;;  %v1766_v59 = vpop.permute.xlu0 %1765 }
 0x397   : > { %1917 = vst.msk [vmem:[#allocation3 + $0x40] sm:$0xff] %vm1908_vm10, %v1877_v18 }
 0x398   : > { %1805 = vst.msk [vmem:[#allocation3 + $0x48] sm:$0xff] %vm1795_vm9, %v1766_v59 }
 0x39a   : > { %v1447_v63 = vpop.permute.xlu1 %1446  ;;  %v1046_v3 = vpop.permute.xlu0 %1045 }
 0x39b   : > { %1484 = vst.msk [vmem:[#allocation3 + $0x58] sm:$0xff] %vm1472_vm6, %v1447_v63 }
 0x39c   : > { %1082 = vst.msk [vmem:[#allocation3 + $0x60] sm:$0xff] %vm1069_vm3, %v1046_v3 }
 0x39e   : > { %v1879_v0 = vpop.permute.xlu1 %1878  ;;  %v1558_v1 = vpop.permute.xlu0 %1557  ;;  %v1933_v40 = vld [vmem:[#allocation3 + $0x40] sm:$0xff] }
 0x39f   : > { %1918 = vst.msk [vmem:[#allocation3 + $0x48] sm:$0xff] %vm1908_vm10, %v1879_v0  ;;  %2744 = vmatprep.mubr.msk.f32.mxu1 %vm1953_vm11, %v1933_v40 }
 0x3a0   : > { %1596 = vst.msk [vmem:[#allocation3 + $0x50] sm:$0xff] %vm1585_vm7, %v1558_v1 }
 0x3a2   : > { %v1239_v2 = vpop.permute.xlu1 %1238  ;;  %v1048_v6 = vpop.permute.xlu0 %1047 }
 0x3a3   : > { %1275 = vst.msk [vmem:[#allocation3 + $0x60] sm:$0xff] %vm1262_vm4, %v1239_v2 }
 0x3a4   : > { %1083 = vst.msk [vmem:[#allocation3 + $0x68] sm:$0xff] %vm1069_vm3, %v1048_v6 }
 0x3a6   : > { %v1671_v25 = vpop.permute.xlu1 %1670  ;;  %v1560_v7 = vpop.permute.xlu0 %1559  ;;  %v1934_v8 = vld [vmem:[#allocation3 + $0x48] sm:$0xff] }
 0x3a7   : > { %1709 = vst.msk [vmem:[#allocation3 + $0x50] sm:$0xff] %vm1698_vm8, %v1671_v25  ;;  %2745 = vmatmul.mubr.msk.f32.gmra.mrb[16].mxu1 %vm1953_vm11, %v1934_v8 }
 0x3a8   : > { %1597 = vst.msk [vmem:[#allocation3 + $0x58] sm:$0xff] %vm1585_vm7, %v1560_v7 }
 0x3aa   : > { %v1352_v9 = vpop.permute.xlu1 %1351  ;;  %v1241_v61 = vpop.permute.xlu0 %1240 }
 0x3ab   : > { %1388 = vst.msk [vmem:[#allocation3 + $0x60] sm:$0xff] %vm1375_vm5, %v1352_v9 }
 0x3ac   : > { %1276 = vst.msk [vmem:[#allocation3 + $0x68] sm:$0xff] %vm1262_vm4, %v1241_v61 }
 0x3ae   : > { %v1768_v33 = vpop.permute.xlu1 %1767  ;;  %v1673_v12 = vpop.permute.xlu0 %1672 }
 0x3af   : > { %1806 = vst.msk [vmem:[#allocation3 + $0x50] sm:$0xff] %vm1795_vm9, %v1768_v33 }
 0x3b0   : > { %1710 = vst.msk [vmem:[#allocation3 + $0x58] sm:$0xff] %vm1698_vm8, %v1673_v12 }
 0x3b2   : > { %v1449_v13 = vpop.permute.xlu1 %1448  ;;  %v1354_v41 = vpop.permute.xlu0 %1353 }
 0x3b3   : > { %1485 = vst.msk [vmem:[#allocation3 + $0x60] sm:$0xff] %vm1472_vm6, %v1449_v13 }
 0x3b4   : > { %1389 = vst.msk [vmem:[#allocation3 + $0x68] sm:$0xff] %vm1375_vm5, %v1354_v41 }
 0x3b6   : > { %v1881_v29 = vpop.permute.xlu1 %1880  ;;  %v1770_v15 = vpop.permute.xlu0 %1769 }
 0x3b7   : > { %1919 = vst.msk [vmem:[#allocation3 + $0x50] sm:$0xff] %vm1908_vm10, %v1881_v29 }
 0x3b8   : > { %1807 = vst.msk [vmem:[#allocation3 + $0x58] sm:$0xff] %vm1795_vm9, %v1770_v15 }
 0x3ba   : > { %v1451_v16 = vpop.permute.xlu1 %1450  ;;  %v1050_v20 = vpop.permute.xlu0 %1049 }
 0x3bb   : > { %1486 = vst.msk [vmem:[#allocation3 + $0x68] sm:$0xff] %vm1472_vm6, %v1451_v16 }
 0x3bc   : > { %1084 = vst.msk [vmem:[#allocation3 + $0x70] sm:$0xff] %vm1069_vm3, %v1050_v20 }
 0x3be   : > { %v1883_v5 = vpop.permute.xlu1 %1882  ;;  %v1562_v23 = vpop.permute.xlu0 %1561  ;;  %v1935_v4 = vld [vmem:[#allocation3 + $0x50] sm:$0xff] }
 0x3bf   : > { %1920 = vst.msk [vmem:[#allocation3 + $0x58] sm:$0xff] %vm1908_vm10, %v1883_v5  ;;  %2747 = vmatprep.mubr.msk.f32.mxu1 %vm1953_vm11, %v1935_v4 }
 0x3c0   : > { %1598 = vst.msk [vmem:[#allocation3 + $0x60] sm:$0xff] %vm1585_vm7, %v1562_v23 }
 0x3c2   : > { %v1243_v22 = vpop.permute.xlu1 %1242  ;;  %v1052_v47 = vpop.permute.xlu0 %1051 }
 0x3c3   : > { %1277 = vst.msk [vmem:[#allocation3 + $0x70] sm:$0xff] %vm1262_vm4, %v1243_v22 }
 0x3c4   : > { %1085 = vst.msk [vmem:[#allocation3 + $0x78] sm:$0xff] %vm1069_vm3, %v1052_v47 }
 0x3c6   : > { %v1675_v26 = vpop.permute.xlu1 %1674  ;;  %v1564_v27 = vpop.permute.xlu0 %1563  ;;  %v1936_v14 = vld [vmem:[#allocation3 + $0x58] sm:$0xff] }
 0x3c7   : > { %1711 = vst.msk [vmem:[#allocation3 + $0x60] sm:$0xff] %vm1698_vm8, %v1675_v26  ;;  %2748 = vmatmul.mubr.msk.f32.gmra.mrb[18].mxu1 %vm1953_vm11, %v1936_v14 }
 0x3c8   : > { %1599 = vst.msk [vmem:[#allocation3 + $0x68] sm:$0xff] %vm1585_vm7, %v1564_v27 }
 0x3ca   : > { %v1356_v28 = vpop.permute.xlu1 %1355  ;;  %v1245_v10 = vpop.permute.xlu0 %1244 }
 0x3cb   : > { %1390 = vst.msk [vmem:[#allocation3 + $0x70] sm:$0xff] %vm1375_vm5, %v1356_v28 }
 0x3cc   : > { %1278 = vst.msk [vmem:[#allocation3 + $0x78] sm:$0xff] %vm1262_vm4, %v1245_v10 }
 0x3ce   : > { %v1772_v19 = vpop.permute.xlu1 %1771  ;;  %v1677_v31 = vpop.permute.xlu0 %1676 }
 0x3cf   : > { %1808 = vst.msk [vmem:[#allocation3 + $0x60] sm:$0xff] %vm1795_vm9, %v1772_v19 }
 0x3d0   : > { %1712 = vst.msk [vmem:[#allocation3 + $0x68] sm:$0xff] %vm1698_vm8, %v1677_v31 }
 0x3d2   : > { %v1453_v54 = vpop.permute.xlu1 %1452  ;;  %v1358_v34 = vpop.permute.xlu0 %1357 }
 0x3d3   : > { %1487 = vst.msk [vmem:[#allocation3 + $0x70] sm:$0xff] %vm1472_vm6, %v1453_v54 }
 0x3d4   : > { %1391 = vst.msk [vmem:[#allocation3 + $0x78] sm:$0xff] %vm1375_vm5, %v1358_v34 }
 0x3d6   : > { %v1885_v30 = vpop.permute.xlu1 %1884  ;;  %v1774_v21 = vpop.permute.xlu0 %1773 }
 0x3d7   : > { %1921 = vst.msk [vmem:[#allocation3 + $0x60] sm:$0xff] %vm1908_vm10, %v1885_v30 }
 0x3d8   : > { %1809 = vst.msk [vmem:[#allocation3 + $0x68] sm:$0xff] %vm1795_vm9, %v1774_v21  ;;  %v3922_v21 = vld [vmem:[%s4018_s6] ss:$0 sm:$0xff] }
 0x3da   : > { %v1566_v35 = vpop.permute.xlu1 %1565  ;;  %v1455_v36 = vpop.permute.xlu0 %1454 }
 0x3db   : > { %1600 = vst.msk [vmem:[#allocation3 + $0x70] sm:$0xff] %vm1585_vm7, %v1566_v35  ;;  %v2169_v35 = vld [vmem:[%s3178_s30 + $0x8] sm:$0xff] }
 0x3dc   : > { %1488 = vst.msk [vmem:[#allocation3 + $0x78] sm:$0xff] %vm1472_vm6, %v1455_v36 }
 0x3de   : > { %v1568_v38 = vpop.permute.xlu1 %1567  ;;  %v1887_v48 = vpop.permute.xlu0 %1886  ;;  %v1937_v39 = vld [vmem:[#allocation3 + $0x60] sm:$0xff] }
 0x3df   : > { %1601 = vst.msk [vmem:[#allocation3 + $0x78] sm:$0xff] %vm1585_vm7, %v1568_v38  ;;  %2750 = vmatprep.mubr.msk.f32.mxu1 %vm1953_vm11, %v1937_v39 }
 0x3e0   : > { %1922 = vst.msk [vmem:[#allocation3 + $0x68] sm:$0xff] %vm1908_vm10, %v1887_v48  ;;  %v2168_v48 = vld [vmem:[%s3178_s30] sm:$0xff] }
 0x3e2   : > { %v1681_v37 = vpop.permute.xlu1 %1680  ;;  %v1679_v42 = vpop.permute.xlu0 %1678 }
 0x3e3   : > { %1714 = vst.msk [vmem:[#allocation3 + $0x78] sm:$0xff] %vm1698_vm8, %v1681_v37  ;;  %1713 = vst.msk [vmem:[#allocation3 + $0x70] sm:$0xff] %vm1698_vm8, %v1679_v42 }
 0x3e6   : > { %v1778_v24 = vpop.permute.xlu1 %1777  ;;  %v1776_v17 = vpop.permute.xlu0 %1775 }
 0x3e7   : > { %v1938_v44 = vld [vmem:[#allocation3 + $0x68] sm:$0xff]  ;;  %1811 = vst.msk [vmem:[#allocation3 + $0x78] sm:$0xff] %vm1795_vm9, %v1778_v24  ;;  %1810 = vst.msk [vmem:[#allocation3 + $0x70] sm:$0xff] %vm1795_vm9, %v1776_v17 }
 0x3e8   : > { %2751 = vmatmul.mubr.msk.f32.gmra.mrb[20].mxu1 %vm1953_vm11, %v1938_v44 }
 0x3ea   : > { %v1891_v55 = vpop.permute.xlu1 %1890  ;;  %v1889_v45 = vpop.permute.xlu0 %1888 }
 0x3eb   : > { %1924 = vst.msk [vmem:[#allocation3 + $0x78] sm:$0xff] %vm1908_vm10, %v1891_v55  ;;  %1923 = vst.msk [vmem:[#allocation3 + $0x70] sm:$0xff] %vm1908_vm10, %v1889_v45  ;;  %v2171_v55 = vld [vmem:[%s3178_s30 + $0x18] sm:$0xff] }
 0x3f2   : > { %v1939_v62 = vld [vmem:[#allocation3 + $0x70] sm:$0xff]  ;;  %v1940_v46 = vld [vmem:[#allocation3 + $0x78] sm:$0xff] }
 0x3f3   : > { %2753 = vmatprep.mubr.msk.f32.mxu1 %vm1953_vm11, %v1939_v62 }
 0x3f4   : > { %2754 = vmatmul.mubr.msk.f32.gmra.mrb[22].mxu1 %vm1953_vm11, %v1940_v46  ;;  %v2170_v46 = vld [vmem:[%s3178_s30 + $0x10] sm:$0xff] }
 0x402   : > { %v2734_v49 = vpop.f32.mrb[8].mxu1 }
 0x403   : > { %v2078_v50 = vadd.f32 %v2734_v49, %v2576_v43  ;;  %v2072_v51 = vpop.f32.mrb[9].mxu1 }
 0x404   : > { %v2073_v11 = vadd.f32 %v2576_v43, %v2072_v51 }
 0x405   : > { %v2152_v32 = vmax.f32 %v2078_v50, 0.0 }
 0x406   : > { %v2151_v52 = vmax.f32 %v2073_v11, 0.0 }
 0x408   : > { %2758 = vmatprep.mubr.msk.f32.mxu0 %vm380_vm0, %v2151_v52 }
 0x409   : > { %2759 = vmatmul.mubr.msk.f32.vlgmr.msra.gmra.mrb[12].mxu0 %vm380_vm0, %v2152_v32  ;;  %v2173_v32 = vld [vmem:[%s3178_s30 + $0x28] sm:$0xff] }
 0x41a   : > { %v2737_v53 = vpop.f32.mrb[10].mxu1 }
 0x41b   : > { %v2088_v60 = vadd.f32 %v2737_v53, %v2576_v43  ;;  %v2082_v56 = vpop.f32.mrb[11].mxu1 }
 0x41c   : > { %v2083_v57 = vadd.f32 %v2576_v43, %v2082_v56  ;;  %v2172_v56 = vld [vmem:[%s3178_s30 + $0x20] sm:$0xff] }
 0x41d   : > { %v2154_v18 = vmax.f32 %v2088_v60, 0.0 }
 0x41e   : > { %v2153_v58 = vmax.f32 %v2083_v57, 0.0 }
 0x420   : > { %2761 = vmatprep.mubr.msk.f32.mxu0 %vm380_vm0, %v2153_v58 }
 0x421   : > { %2762 = vmatmul.mubr.msk.f32.gmra.mrb[14].mxu0 %vm380_vm0, %v2154_v18 }
 0x43a   : > { %v2740_v59 = vpop.f32.mrb[12].mxu1 }
 0x43b   : > { %v2098_v63 = vadd.f32 %v2740_v59, %v2576_v43  ;;  %v2092_v3 = vpop.f32.mrb[13].mxu1 }
 0x43c   : > { %v2093_v0 = vadd.f32 %v2576_v43, %v2092_v3 }
 0x43d   : > { %v2156_v40 = vmax.f32 %v2098_v63, 0.0 }
 0x43e   : > { %v2155_v1 = vmax.f32 %v2093_v0, 0.0  ;;  %v2175_v0 = vld [vmem:[%s3178_s30 + $0x38] sm:$0xff] }
 0x440   : > { %2764 = vmatprep.mubr.msk.f32.mxu0 %vm380_vm0, %v2155_v1 }
 0x441   : > { %2765 = vmatmul.mubr.msk.f32.gmra.mrb[16].mxu0 %vm380_vm0, %v2156_v40 }
 0x45a   : > { %v2743_v2 = vpop.f32.mrb[14].mxu1 }
 0x45b   : > { %v2108_v6 = vadd.f32 %v2743_v2, %v2576_v43  ;;  %v2102_v25 = vpop.f32.mrb[15].mxu1  ;;  %v2174_v2 = vld [vmem:[%s3178_s30 + $0x30] sm:$0xff] }
 0x45c   : > { %v2103_v7 = vadd.f32 %v2576_v43, %v2102_v25 }
 0x45d   : > { %v2158_v9 = vmax.f32 %v2108_v6, 0.0 }
 0x45e   : > { %v2157_v8 = vmax.f32 %v2103_v7, 0.0 }
 0x460   : > { %2767 = vmatprep.mubr.msk.f32.mxu0 %vm380_vm0, %v2157_v8 }
 0x461   : > { %2768 = vmatmul.mubr.msk.f32.gmra.mrb[18].mxu0 %vm380_vm0, %v2158_v9 }
 0x47a   : > { %v2746_v61 = vpop.f32.mrb[16].mxu1 }
 0x47b   : > { %v2118_v33 = vadd.f32 %v2746_v61, %v2576_v43  ;;  %v2112_v12 = vpop.f32.mrb[17].mxu1 }
 0x47c   : > { %v2113_v13 = vadd.f32 %v2576_v43, %v2112_v12 }
 0x47d   : > { %v2160_v29 = vmax.f32 %v2118_v33, 0.0  ;;  %v2177_v33 = vld [vmem:[%s3178_s30 + $0x48] sm:$0xff] }
 0x47e   : > { %v2159_v41 = vmax.f32 %v2113_v13, 0.0 }
 0x480   : > { %2770 = vmatprep.mubr.msk.f32.mxu0 %vm380_vm0, %v2159_v41  ;;  %v2176_v41 = vld [vmem:[%s3178_s30 + $0x40] sm:$0xff] }
 0x481   : > { %2771 = vmatmul.mubr.msk.f32.gmra.mrb[20].mxu0 %vm380_vm0, %v2160_v29 }
 0x49a   : > { %v2749_v15 = vpop.f32.mrb[18].mxu1 }
 0x49b   : > { %v2128_v16 = vadd.f32 %v2749_v15, %v2576_v43  ;;  %v2122_v20 = vpop.f32.mrb[19].mxu1 }
 0x49c   : > { %v2123_v5 = vadd.f32 %v2576_v43, %v2122_v20 }
 0x49d   : > { %v2162_v4 = vmax.f32 %v2128_v16, 0.0 }
 0x49e   : > { %v2161_v23 = vmax.f32 %v2123_v5, 0.0 }
 0x4a0   : > { %2773 = vmatprep.mubr.msk.f32.mxu0 %vm380_vm0, %v2161_v23 }
 0x4a1   : > { %2774 = vmatmul.mubr.msk.f32.gmra.mrb[22].mxu0 %vm380_vm0, %v2162_v4  ;;  %v2179_v4 = vld [vmem:[%s3178_s30 + $0x58] sm:$0xff] }
 0x4bb   : > { %v2752_v22 = vpop.f32.mrb[20].mxu1 }
 0x4bc   : > { %v2138_v47 = vadd.f32 %v2752_v22, %v2576_v43  ;;  %v2132_v26 = vpop.f32.mrb[21].mxu1 }
 0x4bd   : > { %v2133_v27 = vadd.f32 %v2576_v43, %v2132_v26  ;;  %v2178_v26 = vld [vmem:[%s3178_s30 + $0x50] sm:$0xff] }
 0x4be   : > { %v2164_v28 = vmax.f32 %v2138_v47, 0.0 }
 0x4bf   : > { %v2163_v14 = vmax.f32 %v2133_v27, 0.0 }
 0x4c1   : > { %2776 = vmatprep.mubr.msk.f32.mxu0 %vm380_vm0, %v2163_v14 }
 0x4c2   : > { %2777 = vmatmul.mubr.msk.f32.gmra.mrb[24].mxu0 %vm380_vm0, %v2164_v28 }
 0x4c7   : > { %v2755_v10 = vpop.f32.mrb[22].mxu1 }
 0x4c8   : > { %v2148_v19 = vadd.f32 %v2755_v10, %v2576_v43  ;;  %v2142_v31 = vpop.f32.mrb[23].mxu1 }
 0x4c9   : > { %v2143_v54 = vadd.f32 %v2576_v43, %v2142_v31 }
 0x4ca   : > { %v2166_v30 = vmax.f32 %v2148_v19, 0.0 }
 0x4cb   : > { %v2165_v34 = vmax.f32 %v2143_v54, 0.0  ;;  %v2181_v54 = vld [vmem:[%s3178_s30 + $0x68] sm:$0xff] }
 0x4cd   : > { %2779 = vmatprep.mubr.msk.f32.mxu0 %vm380_vm0, %v2165_v34 }
 0x4ce   : > { %2780 = vmatmul.mubr.msk.f32.gmra.mrb[26].mxu0 %vm380_vm0, %v2166_v30 }
 0x4dc   : > { %v2760_v36 = vpop.f32.mrb[12].mxu0 }
 0x4dd   : > { %v2314_v38 = vadd.f32 %v2760_v36, %v3922_v21  ;;  %v2308_v39 = vpop.f32.mrb[13].mxu0 }
 0x4de   : > { %v2309_v37 = vadd.f32 %v3922_v21, %v2308_v39 }
 0x4df   : > { %v2388_v42 = vadd.f32 %v2314_v38, %v2169_v35  ;;  %v2180_v35 = vld [vmem:[%s3178_s30 + $0x60] sm:$0xff] }
 0x4e0   : > { %v2387_v24 = vadd.f32 %v2309_v37, %v2168_v48 }
 0x4e1   : > { %v2404_v17 = vmax.f32 %v2388_v42, 0.0 }
 0x4e2   : > { %v2403_v44 = vmax.f32 %v2387_v24, 0.0  ;;  %v2183_v24 = vld [vmem:[%s3178_s30 + $0x78] sm:$0xff] }
 0x4e3   : > { %2420 = vst.msk [vmem:[%s3186_s29 + $0x8] sm:$0xff] %vm407_vm1, %v2404_v17 }
 0x4e4   : > { %2419 = vst.msk [vmem:[%s3186_s29] sm:$0xff] %vm407_vm1, %v2403_v44 }
 0x4f4   : > { %v2763_v45 = vpop.f32.mrb[14].mxu0 }
 0x4f5   : > { %v2324_v62 = vadd.f32 %v2763_v45, %v3922_v21  ;;  %v2318_v43 = vpop.f32.mrb[15].mxu0 }
 0x4f6   : > { %v2319_v49 = vadd.f32 %v3922_v21, %v2318_v43 }
 0x4f7   : > { %v2390_v50 = vadd.f32 %v2324_v62, %v2171_v55  ;;  %v2182_v55 = vld [vmem:[%s3178_s30 + $0x70] sm:$0xff] }
 0x4f8   : > { %v2389_v51 = vadd.f32 %v2319_v49, %v2170_v46 }
 0x4f9   : > { %v2406_v11 = vmax.f32 %v2390_v50, 0.0 }
 0x4fa   : > { %v2405_v52 = vmax.f32 %v2389_v51, 0.0 }
 0x4fb   : > { %2422 = vst.msk [vmem:[%s3186_s29 + $0x18] sm:$0xff] %vm407_vm1, %v2406_v11 }
 0x4fc   : > { %2421 = vst.msk [vmem:[%s3186_s29 + $0x10] sm:$0xff] %vm407_vm1, %v2405_v52 }
 0x514   : > { %v2766_v53 = vpop.f32.mrb[16].mxu0 }
 0x515   : > { %v2334_v60 = vadd.f32 %v2766_v53, %v3922_v21  ;;  %v2328_v57 = vpop.f32.mrb[17].mxu0 }
 0x516   : > { %v2329_v58 = vadd.f32 %v3922_v21, %v2328_v57 }
 0x517   : > { %v2392_v18 = vadd.f32 %v2334_v60, %v2173_v32 }
 0x518   : > { %v2391_v59 = vadd.f32 %v2329_v58, %v2172_v56 }
 0x519   : > { %v2408_v63 = vmax.f32 %v2392_v18, 0.0 }
 0x51a   : > { %v2407_v3 = vmax.f32 %v2391_v59, 0.0 }
 0x51b   : > { %2424 = vst.msk [vmem:[%s3186_s29 + $0x28] sm:$0xff] %vm407_vm1, %v2408_v63 }
 0x51c   : > { %2423 = vst.msk [vmem:[%s3186_s29 + $0x20] sm:$0xff] %vm407_vm1, %v2407_v3 }
 0x534   : > { %v2769_v1 = vpop.f32.mrb[18].mxu0 }
 0x535   : > { %v2344_v40 = vadd.f32 %v2769_v1, %v3922_v21  ;;  %v2338_v6 = vpop.f32.mrb[19].mxu0 }
 0x536   : > { %v2339_v25 = vadd.f32 %v3922_v21, %v2338_v6 }
 0x537   : > { %v2394_v7 = vadd.f32 %v2344_v40, %v2175_v0 }
 0x538   : > { %v2393_v8 = vadd.f32 %v2339_v25, %v2174_v2 }
 0x539   : > { %v2410_v9 = vmax.f32 %v2394_v7, 0.0 }
 0x53a   : > { %v2409_v61 = vmax.f32 %v2393_v8, 0.0 }
 0x53b   : > { %2426 = vst.msk [vmem:[%s3186_s29 + $0x38] sm:$0xff] %vm407_vm1, %v2410_v9 }
 0x53c   : > { %2425 = vst.msk [vmem:[%s3186_s29 + $0x30] sm:$0xff] %vm407_vm1, %v2409_v61 }
 0x554   : > { %v2772_v12 = vpop.f32.mrb[20].mxu0 }
 0x555   : > { %v2354_v13 = vadd.f32 %v2772_v12, %v3922_v21  ;;  %v2348_v29 = vpop.f32.mrb[21].mxu0 }
 0x556   : > { %v2349_v15 = vadd.f32 %v3922_v21, %v2348_v29 }
 0x557   : > { %v2396_v16 = vadd.f32 %v2354_v13, %v2177_v33 }
 0x558   : > { %v2395_v20 = vadd.f32 %v2349_v15, %v2176_v41 }
 0x559   : > { %v2412_v5 = vmax.f32 %v2396_v16, 0.0 }
 0x55a   : > { %v2411_v23 = vmax.f32 %v2395_v20, 0.0 }
 0x55b   : > { %2428 = vst.msk [vmem:[%s3186_s29 + $0x48] sm:$0xff] %vm407_vm1, %v2412_v5 }
 0x55c   : > { %2427 = vst.msk [vmem:[%s3186_s29 + $0x40] sm:$0xff] %vm407_vm1, %v2411_v23 }
 0x574   : > { %v2775_v22 = vpop.f32.mrb[22].mxu0 }
 0x575   : > { %v2364_v47 = vadd.f32 %v2775_v22, %v3922_v21  ;;  %v2358_v27 = vpop.f32.mrb[23].mxu0 }
 0x576   : > { %v2359_v14 = vadd.f32 %v3922_v21, %v2358_v27 }
 0x577   : > { %v2398_v28 = vadd.f32 %v2364_v47, %v2179_v4 }
 0x578   : > { %v2397_v10 = vadd.f32 %v2359_v14, %v2178_v26 }
 0x579   : > { %v2414_v19 = vmax.f32 %v2398_v28, 0.0 }
 0x57a   : > { %v2413_v31 = vmax.f32 %v2397_v10, 0.0 }
 0x57b   : > { %2430 = vst.msk [vmem:[%s3186_s29 + $0x58] sm:$0xff] %vm407_vm1, %v2414_v19 }
 0x57c   : > { %2429 = vst.msk [vmem:[%s3186_s29 + $0x50] sm:$0xff] %vm407_vm1, %v2413_v31 }
 0x595   : > { %v2778_v34 = vpop.f32.mrb[24].mxu0 }
 0x596   : > { %v2374_v30 = vadd.f32 %v2778_v34, %v3922_v21  ;;  %v2368_v36 = vpop.f32.mrb[25].mxu0 }
 0x597   : > { %v2369_v38 = vadd.f32 %v3922_v21, %v2368_v36 }
 0x598   : > { %v2400_v48 = vadd.f32 %v2374_v30, %v2181_v54 }
 0x599   : > { %v2399_v39 = vadd.f32 %v2369_v38, %v2180_v35 }
 0x59a   : > { %v2416_v37 = vmax.f32 %v2400_v48, 0.0 }
 0x59b   : > { %v2415_v42 = vmax.f32 %v2399_v39, 0.0 }
 0x59c   : > { %2432 = vst.msk [vmem:[%s3186_s29 + $0x68] sm:$0xff] %vm407_vm1, %v2416_v37 }
 0x59d   : > { %2431 = vst.msk [vmem:[%s3186_s29 + $0x60] sm:$0xff] %vm407_vm1, %v2415_v42 }
 0x5a1   : > { %v2781_v17 = vpop.f32.mrb[26].mxu0 }
 0x5a2   : > { %v2384_v44 = vadd.f32 %v2781_v17, %v3922_v21  ;;  %v2378_v45 = vpop.f32.mrb[27].mxu0 }
 0x5a3   : > { %v2379_v62 = vadd.f32 %v3922_v21, %v2378_v45 }
 0x5a4   : > { %v2402_v46 = vadd.f32 %v2384_v44, %v2183_v24 }
 0x5a5   : > { %v2401_v43 = vadd.f32 %v2379_v62, %v2182_v55 }
 0x5a6   : > { %v2418_v49 = vmax.f32 %v2402_v46, 0.0 }
 0x5a7   : > { %v2417_v50 = vmax.f32 %v2401_v43, 0.0 }
 0x5a8   : > { %2434 = vst.msk [vmem:[%s3186_s29 + $0x78] sm:$0xff] %vm407_vm1, %v2418_v49 }
 0x5a9   : > { %2433 = vst.msk [vmem:[%s3186_s29 + $0x70] sm:$0xff] %vm407_vm1, %v2417_v50 }
 0x5aa PF: > { %s22_s16 = sadd.s32 1, %s2987_s16   ;;  %s4030_s19 = sld [smem:[#allocation7_spill]] }
 0x5ab   : > { %p19_p11 = scmp.ge.s32.totalorder %s22_s16, 6   ;;  %s4031_s0 = sld [smem:[#allocation8_spill]] }
 0x5ac   : > { %s4032_s30 = smov %s2963_s10  ;;  %s4033_s10 = smov %s2967_s11 }
 0x5ad   : > { %s4034_s11 = smov %s3119_s27  ;;  %s4035_s12 = smov %s2979_s14 }
 0x5ae   : > { %s4036_s13 = smov %s2983_s15  ;;  %21 = sbr.rel (!%p19_p11) target bundleno = 7 (0x7), region = 107 }
 0x5b0   : > { %s4037_s14 = smov %s4030_s19 }
 0x5b1   : > { %s4038_s15 = smov %s4031_s0 }
 0x5b5   :  { %2465 = vsyncpa [#allocation5], 1 }
 0x5b6   :  { %2467 = vsyncpa [#allocation5 + $0x1], 1 }

</bundles_post_ra>
